<compile_context>
chip_gen: v6e
topology: v6e:2x2x1
jax: 0.10.0
libtpu: 0.0.40
codegen_flags: <defaults>
</compile_context>

<pallas_src>
import functools

import jax
import jax.numpy as jnp
from jax.experimental import pallas as pl
from jax.experimental.pallas import tpu as pltpu

EPS = 1e-6


# ----------------------------------------------------------------------------
# Kernel
# ----------------------------------------------------------------------------
def _layernorm(x, gamma, beta):
    mu = jnp.mean(x, axis=-1, keepdims=True)
    xc = x - mu
    var = jnp.mean(xc * xc, axis=-1, keepdims=True)
    return xc * jax.lax.rsqrt(var + EPS) * gamma + beta


def _poly_block_kernel(*refs, use_lora, compute_dtype):
    if use_lora:
        (x_ref, gamma_ref, beta_ref, a_ref, b_ref,
         w1ab_ref, b1ab_ref, w1s_ref, b1s_ref, w1c_ref, b1c_ref,
         w2ab_ref, b2ab_ref, w2c_ref, b2c_ref, out_ref) = refs
    else:
        (x_ref, gamma_ref, beta_ref,
         w1ab_ref, b1ab_ref, w1s_ref, b1s_ref, w1c_ref, b1c_ref,
         w2ab_ref, b2ab_ref, w2c_ref, b2c_ref, out_ref) = refs
        a_ref = b_ref = None

    bt, n, c = x_ref.shape
    c2 = w1c_ref.shape[0]
    h2 = w2c_ref.shape[0]
    cd = compute_dtype

    x = x_ref[...].astype(jnp.float32).reshape(bt * n, c)   # (Bt*N, C)
    gamma = gamma_ref[...]                                   # (1, C)
    beta = beta_ref[...]                                     # (1, C)

    # z = self.norm(x)
    z = _layernorm(x, gamma, beta)                           # f32 (Bt*N, C)
    zc = z.astype(cd)

    # mlp1 (use_spatial=True): fused branch matmul, then spatial mix on branch 2
    h12 = jnp.dot(zc, w1ab_ref[...],
                  preferred_element_type=jnp.float32) + b1ab_ref[...]   # (Bt*N, 2*C2)
    x1 = h12[:, :c2]
    x2 = h12[:, c2:].reshape(bt, n, c2).astype(cd)
    w1s = w1s_ref[...]
    b1s = b1s_ref[...]
    x2m = jnp.concatenate(
        [jnp.dot(w1s, x2[i], preferred_element_type=jnp.float32) + b1s
         for i in range(bt)],
        axis=0)                                              # (Bt*N, C2) f32
    h1 = x1 * x2m + x1
    z1 = jnp.dot(h1.astype(cd), w1c_ref[...],
                 preferred_element_type=jnp.float32) + b1c_ref[...]     # (Bt*N, C)

    # x = x + drop_path(z)   (drop_path == Identity)
    xr = x + z1

    # LoRA branch, low-rank form:  z_lora = B_cat @ (A_cat @ z)
    if use_lora:
        a_cat = a_ref[...]                                   # (R_tot, N)
        b_cat = b_ref[...]                                   # (N, R_tot)
        z3d = zc.reshape(bt, n, c)
        z_lora = jnp.concatenate(
            [jnp.dot(
                b_cat,
                jnp.dot(a_cat, z3d[i],
                        preferred_element_type=jnp.float32).astype(cd),
                preferred_element_type=jnp.float32)
             for i in range(bt)],
            axis=0)                                          # (Bt*N, C) f32
    else:
        # task < 0: the LoRA linear is skipped, z_lora == norm(x)
        z_lora = z

    # z = self.norm(x); z = self.mlp2(z)   (use_spatial=False)
    z2 = _layernorm(xr, gamma, beta).astype(cd)
    ab = jnp.dot(z2, w2ab_ref[...],
                 preferred_element_type=jnp.float32) + b2ab_ref[...]    # (Bt*N, 2*H2)
    a1 = ab[:, :h2]
    a2 = ab[:, h2:]
    hh = a1 * a2 + a1
    z3 = jnp.dot(hh.astype(cd), w2c_ref[...],
                 preferred_element_type=jnp.float32) + b2c_ref[...]     # (Bt*N, C)

    # x = x + drop_path(z) + z_lora
    out = xr + z3 + z_lora
    out_ref[...] = out.reshape(bt, n, c).astype(out_ref.dtype)


# ----------------------------------------------------------------------------
# Wrapper
# ----------------------------------------------------------------------------
def poly_block_lora(x_nhwc, params, task, *, compute_dtype=jnp.bfloat16,
                    block_b=None):
    B, H, W, C = x_nhwc.shape
    N = H * W
    task = int(task)
    use_lora = task > -0.5
    cd = compute_dtype
    f32 = jnp.float32

    x_tok = x_nhwc.reshape(B, N, C).astype(f32)

    # Fused branch weights: one MXU push per poly-MLP stage instead of two.
    w1ab = jnp.concatenate([params["w1a"], params["w1b"]], axis=1).astype(cd)
    b1ab = jnp.concatenate([params["b1a"], params["b1b"]], axis=1).astype(f32)
    w2ab = jnp.concatenate([params["w2a"], params["w2b"]], axis=1).astype(cd)
    b2ab = jnp.concatenate([params["b2a"], params["b2b"]], axis=1).astype(f32)

    gamma = params["gamma"].astype(f32)
    beta = params["beta"].astype(f32)
    w1s = params["w1s"].astype(cd)
    b1s = params["b1s"].astype(f32)
    w1c = params["w1c"].astype(cd)
    b1c = params["b1c"].astype(f32)
    w2c = params["w2c"].astype(cd)
    b2c = params["b2c"].astype(f32)

    ins = [x_tok, gamma, beta]
    r_tot = 0
    if use_lora:
        T = task + 1
        r = params["lora_A"].shape[1]
        r_tot = T * r
        # W_lora = sum_t B_t @ A_t  ==  B_cat @ A_cat  (never materialized)
        a_cat = params["lora_A"][:T].reshape(r_tot, N).astype(cd)
        b_cat = params["lora_B"][:T].transpose(1, 0, 2).reshape(N, r_tot).astype(cd)
        ins += [a_cat, b_cat]
    ins += [w1ab, b1ab, w1s, b1s, w1c, b1c, w2ab, b2ab, w2c, b2c]

    # Batch tile: several images per grid step to amortize grid overhead and
    # constant-weight residency (divisor of B for simplicity).
    if block_b is None:
        block_b = min(B, 8)
    block_b = max(1, min(int(block_b), B))
    while B % block_b:
        block_b -= 1
    # TODO(synk): for B==1 inference on v7x, add a token-tile grid axis so both
    # TensorCores are used (spatial mixing then needs a cross-tile reduction).

    def _const_spec(arr):
        zeros = (0,) * arr.ndim
        return pl.BlockSpec(arr.shape, lambda i, _z=zeros: _z)

    in_specs = [pl.BlockSpec((block_b, N, C), lambda i: (i, 0, 0))]
    in_specs += [_const_spec(a) for a in ins[1:]]
    out_spec = pl.BlockSpec((block_b, N, C), lambda i: (i, 0, 0))

    # VMEM budget: every block is double-buffered by the pipeline; headroom for
    # f32 temporaries (z, h12, xr, ...). Capped at 64 MiB so it also fits v7x.
    x_block_bytes = block_b * N * C * 4
    weight_bytes = sum(int(a.size) * a.dtype.itemsize for a in ins[1:])
    vmem_limit = int(min(2 * (2 * x_block_bytes + weight_bytes) + (16 << 20),
                         64 << 20))

    # Advisory cost estimate so XLA can overlap this call with neighbors.
    C2 = params["w1c"].shape[0]
    H2 = params["w2c"].shape[0]
    flops = 2 * B * N * (C * 2 * C2 + N * C2 + C2 * C + C * 2 * H2 + H2 * C)
    if use_lora:
        flops += 4 * B * N * r_tot * C
    cost = pl.CostEstimate(
        flops=int(flops),
        transcendentals=int(2 * B * N),
        bytes_accessed=int(2 * B * N * C * 4 + weight_bytes))

    kernel = functools.partial(_poly_block_kernel,
                               use_lora=use_lora, compute_dtype=cd)
    out = pl.pallas_call(
        kernel,
        out_shape=jax.ShapeDtypeStruct((B, N, C), jnp.float32),
        grid_spec=pltpu.PrefetchScalarGridSpec(
            num_scalar_prefetch=0,
            grid=(B // block_b,),
            in_specs=in_specs,
            out_specs=out_spec,
        ),
        compiler_params=pltpu.CompilerParams(
            dimension_semantics=("parallel",),
            vmem_limit_bytes=vmem_limit),
        cost_estimate=cost,
    )(*ins)
    return out.reshape(B, H, W, C)


# ----------------------------------------------------------------------------
# Pure-JAX reference (mirrors the PyTorch math) for correctness checking.
# ----------------------------------------------------------------------------
def reference_forward(x_nhwc, p, task):
    B, H, W, C = x_nhwc.shape
    N = H * W

    def ln(t):
        mu = t.mean(-1, keepdims=True)
        var = ((t - mu) ** 2).mean(-1, keepdims=True)
        return (t - mu) / jnp.sqrt(var + EPS) * p["gamma"] + p["beta"]

    x = x_nhwc.reshape(B, N, C).astype(jnp.float32)
    z = ln(x)
    if task > -0.5:
        Wl = sum(p["lora_B"][t] @ p["lora_A"][t] for t in range(int(task) + 1))
        z_lora = jnp.einsum("nm,bmc->bnc", Wl, z)
    else:
        z_lora = z

    x1 = z @ p["w1a"] + p["b1a"]
    x2 = z @ p["w1b"] + p["b1b"]
    x2 = jnp.einsum("nm,bmc->bnc", p["w1s"], x2) + p["b1s"]
    z1 = (x1 * x2 + x1) @ p["w1c"] + p["b1c"]
    xr = x + z1

    z2 = ln(xr)
    a = z2 @ p["w2a"] + p["b2a"]
    b = z2 @ p["w2b"] + p["b2b"]
    z3 = (a * b + a) @ p["w2c"] + p["b2c"]
    out = xr + z3 + z_lora
    return out.reshape(B, H, W, C)


# ----------------------------------------------------------------------------
if __name__ == "__main__":
    # Small, module-consistent shapes.
    B, H, W = 2, 8, 8
    embed_dim = 32                      # C
    expansion_factor = 3
    rank = 4
    n_tasks = 3
    task = 1
    N = H * W                           # lora_in_dim = h*w
    C = embed_dim
    C2 = C // 2                         # mlp1 hidden/2
    H2 = (C * expansion_factor) // 2    # mlp2 hidden/2

    key = jax.random.PRNGKey(0)
    ks = jax.random.split(key, 20)

    def rnd(k, shape, scale=0.1):
        return (scale * jax.random.normal(k, shape)).astype(jnp.float32)

    params = {
        "gamma": (1.0 + 0.05 * jax.random.normal(ks[0], (1, C))).astype(jnp.float32),
        "beta": rnd(ks[1], (1, C), 0.05),
        # lora_B is zero-initialised in init_param(); use nonzero deterministic
        # values here so the LoRA path is actually exercised.
        "lora_A": rnd(ks[2], (n_tasks, rank, N)),
        "lora_B": rnd(ks[3], (n_tasks, N, rank)),
        # mlp1 (use_spatial=True)
        "w1a": rnd(ks[4], (C, C2)), "b1a": rnd(ks[5], (1, C2)),
        "w1b": rnd(ks[6], (C, C2)), "b1b": rnd(ks[7], (1, C2)),
        "w1s": rnd(ks[8], (N, N)),  "b1s": rnd(ks[9], (N, 1)),
        "w1c": rnd(ks[10], (C2, C)), "b1c": rnd(ks[11], (1, C)),
        # mlp2 (use_spatial=False, hidden = expansion_factor * C)
        "w2a": rnd(ks[12], (C, H2)), "b2a": rnd(ks[13], (1, H2)),
        "w2b": rnd(ks[14], (C, H2)), "b2b": rnd(ks[15], (1, H2)),
        "w2c": rnd(ks[16], (H2, C)), "b2c": rnd(ks[17], (1, C)),
    }

    x = jax.random.normal(ks[18], (B, H, W, C), dtype=jnp.float32)

    ref = reference_forward(x, params, task)

    # Structural check: f32 compute path (tolerance absorbs the low-rank LoRA
    # evaluation order + TPU default matmul precision).
    out_f32 = jax.block_until_ready(
        poly_block_lora(x, params, task, compute_dtype=jnp.float32))
    if not jnp.allclose(out_f32, ref, atol=2e-2, rtol=2e-2):
        raise AssertionError("f32 Pallas kernel does not match JAX reference")

    # Performance path: bf16 matmul operands, f32 accumulation (looser check).
    out_bf16 = jax.block_until_ready(
        poly_block_lora(x, params, task, compute_dtype=jnp.bfloat16))
    if not jnp.allclose(out_bf16, ref, atol=1e-1, rtol=1e-1):
        raise AssertionError("bf16 Pallas kernel does not match JAX reference")

    # task < 0 specialization (no LoRA linear; z_lora == norm(x)).
    ref_nl = reference_forward(x, params, -1)
    out_nl = jax.block_until_ready(
        poly_block_lora(x, params, -1, compute_dtype=jnp.float32))
    if not jnp.allclose(out_nl, ref_nl, atol=2e-2, rtol=2e-2):
        raise AssertionError("no-LoRA Pallas kernel does not match JAX reference")

    print("KERNEL_OK")
</pallas_src>

<mosaic_0001>
module attributes {stable_mosaic.version = 11 : i64} {
  func.func @_poly_block_kernel(%arg0: i32, %arg1: memref<2x64x32xf32, #tpu.memory_space<vmem>>, %arg2: memref<1x32xf32, #tpu.memory_space<vmem>>, %arg3: memref<1x32xf32, #tpu.memory_space<vmem>>, %arg4: memref<8x64xf32, #tpu.memory_space<vmem>>, %arg5: memref<64x8xf32, #tpu.memory_space<vmem>>, %arg6: memref<32x32xf32, #tpu.memory_space<vmem>>, %arg7: memref<1x32xf32, #tpu.memory_space<vmem>>, %arg8: memref<64x64xf32, #tpu.memory_space<vmem>>, %arg9: memref<64x1xf32, #tpu.memory_space<vmem>>, %arg10: memref<16x32xf32, #tpu.memory_space<vmem>>, %arg11: memref<1x32xf32, #tpu.memory_space<vmem>>, %arg12: memref<32x96xf32, #tpu.memory_space<vmem>>, %arg13: memref<1x96xf32, #tpu.memory_space<vmem>>, %arg14: memref<48x32xf32, #tpu.memory_space<vmem>>, %arg15: memref<1x32xf32, #tpu.memory_space<vmem>>, %arg16: memref<2x64x32xf32, #tpu.memory_space<vmem>>) attributes {dimension_semantics = [#tpu.dimension_semantics<parallel>], iteration_bounds = array<i64: 1>, scalar_prefetch = 0 : i64, scratch_operands = 0 : i64, tpu.core_type = #tpu.core_type<tc>, window_params = [{transform_indices = @transform_0, window_bounds = array<i64: 2, 64, 32>}, {pipeline_mode = #tpu.pipeline_mode<synchronous>, transform_indices = @transform_1, window_bounds = array<i64: 1, 32>}, {pipeline_mode = #tpu.pipeline_mode<synchronous>, transform_indices = @transform_2, window_bounds = array<i64: 1, 32>}, {pipeline_mode = #tpu.pipeline_mode<synchronous>, transform_indices = @transform_3, window_bounds = array<i64: 8, 64>}, {pipeline_mode = #tpu.pipeline_mode<synchronous>, transform_indices = @transform_4, window_bounds = array<i64: 64, 8>}, {pipeline_mode = #tpu.pipeline_mode<synchronous>, transform_indices = @transform_5, window_bounds = array<i64: 32, 32>}, {pipeline_mode = #tpu.pipeline_mode<synchronous>, transform_indices = @transform_6, window_bounds = array<i64: 1, 32>}, {pipeline_mode = #tpu.pipeline_mode<synchronous>, transform_indices = @transform_7, window_bounds = array<i64: 64, 64>}, {pipeline_mode = #tpu.pipeline_mode<synchronous>, transform_indices = @transform_8, window_bounds = array<i64: 64, 1>}, {pipeline_mode = #tpu.pipeline_mode<synchronous>, transform_indices = @transform_9, window_bounds = array<i64: 16, 32>}, {pipeline_mode = #tpu.pipeline_mode<synchronous>, transform_indices = @transform_10, window_bounds = array<i64: 1, 32>}, {pipeline_mode = #tpu.pipeline_mode<synchronous>, transform_indices = @transform_11, window_bounds = array<i64: 32, 96>}, {pipeline_mode = #tpu.pipeline_mode<synchronous>, transform_indices = @transform_12, window_bounds = array<i64: 1, 96>}, {pipeline_mode = #tpu.pipeline_mode<synchronous>, transform_indices = @transform_13, window_bounds = array<i64: 48, 32>}, {pipeline_mode = #tpu.pipeline_mode<synchronous>, transform_indices = @transform_14, window_bounds = array<i64: 1, 32>}, {transform_indices = @transform_15, window_bounds = array<i64: 2, 64, 32>}]} {
    %c0 = arith.constant 0 : index
    %c0_0 = arith.constant 0 : index
    %c0_1 = arith.constant 0 : index
    %0 = vector.load %arg1[%c0, %c0_0, %c0_1] : memref<2x64x32xf32, #tpu.memory_space<vmem>>, vector<2x64x32xf32>
    %1 = vector.shape_cast %0 : vector<2x64x32xf32> to vector<128x32xf32>
    %c0_2 = arith.constant 0 : index
    %c0_3 = arith.constant 0 : index
    %2 = vector.load %arg2[%c0_2, %c0_3] : memref<1x32xf32, #tpu.memory_space<vmem>>, vector<1x32xf32>
    %c0_4 = arith.constant 0 : index
    %c0_5 = arith.constant 0 : index
    %3 = vector.load %arg3[%c0_4, %c0_5] : memref<1x32xf32, #tpu.memory_space<vmem>>, vector<1x32xf32>
    %cst = arith.constant dense<0.000000e+00> : vector<128xf32>
    %4 = vector.multi_reduction <add>, %1, %cst [1] : vector<128x32xf32> to vector<128xf32>
    %5 = vector.shape_cast %4 : vector<128xf32> to vector<128x1xf32>
    %cst_6 = arith.constant 3.200000e+01 : f32
    %6 = vector.broadcast %cst_6 : f32 to vector<128x1xf32>
    %7 = arith.divf %5, %6 : vector<128x1xf32>
    %8 = vector.broadcast %7 : vector<128x1xf32> to vector<128x32xf32>
    %9 = arith.subf %1, %8 : vector<128x32xf32>
    %10 = arith.mulf %9, %9 : vector<128x32xf32>
    %cst_7 = arith.constant dense<0.000000e+00> : vector<128xf32>
    %11 = vector.multi_reduction <add>, %10, %cst_7 [1] : vector<128x32xf32> to vector<128xf32>
    %12 = vector.shape_cast %11 : vector<128xf32> to vector<128x1xf32>
    %cst_8 = arith.constant 3.200000e+01 : f32
    %13 = vector.broadcast %cst_8 : f32 to vector<128x1xf32>
    %14 = arith.divf %12, %13 : vector<128x1xf32>
    %cst_9 = arith.constant 9.99999997E-7 : f32
    %15 = vector.broadcast %cst_9 : f32 to vector<128x1xf32>
    %16 = arith.addf %14, %15 : vector<128x1xf32>
    %17 = math.rsqrt %16 : vector<128x1xf32>
    %18 = vector.broadcast %17 : vector<128x1xf32> to vector<128x32xf32>
    %19 = arith.mulf %9, %18 : vector<128x32xf32>
    %20 = vector.broadcast %2 : vector<1x32xf32> to vector<128x32xf32>
    %21 = arith.mulf %19, %20 : vector<128x32xf32>
    %22 = vector.broadcast %3 : vector<1x32xf32> to vector<128x32xf32>
    %23 = arith.addf %21, %22 : vector<128x32xf32>
    %c0_10 = arith.constant 0 : index
    %c0_11 = arith.constant 0 : index
    %24 = vector.load %arg6[%c0_10, %c0_11] : memref<32x32xf32, #tpu.memory_space<vmem>>, vector<32x32xf32>
    %cst_12 = arith.constant dense<0.000000e+00> : vector<128x32xf32>
    %25 = tpu.matmul %23, %24, %cst_12 {dimension_numbers = #tpu.dot_dimension_numbers<[1], [0], [0], [1], [0, 0, 1, 1], [], []>} : vector<128x32xf32>, vector<32x32xf32>, vector<128x32xf32> -> vector<128x32xf32>
    %c0_13 = arith.constant 0 : index
    %c0_14 = arith.constant 0 : index
    %26 = vector.load %arg7[%c0_13, %c0_14] : memref<1x32xf32, #tpu.memory_space<vmem>>, vector<1x32xf32>
    %27 = vector.broadcast %26 : vector<1x32xf32> to vector<128x32xf32>
    %28 = arith.addf %25, %27 : vector<128x32xf32>
    %29 = vector.extract_strided_slice %28 {offsets = [0, 0], sizes = [128, 16], strides = [1, 1]} : vector<128x32xf32> to vector<128x16xf32>
    %30 = vector.extract_strided_slice %28 {offsets = [0, 16], sizes = [128, 16], strides = [1, 1]} : vector<128x32xf32> to vector<128x16xf32>
    %31 = vector.shape_cast %30 : vector<128x16xf32> to vector<2x64x16xf32>
    %c0_15 = arith.constant 0 : index
    %c0_16 = arith.constant 0 : index
    %32 = vector.load %arg8[%c0_15, %c0_16] : memref<64x64xf32, #tpu.memory_space<vmem>>, vector<64x64xf32>
    %c0_17 = arith.constant 0 : index
    %c0_18 = arith.constant 0 : index
    %33 = vector.load %arg9[%c0_17, %c0_18] : memref<64x1xf32, #tpu.memory_space<vmem>>, vector<64x1xf32>
    %34 = vector.extract_strided_slice %31 {offsets = [0, 0, 0], sizes = [1, 64, 16], strides = [1, 1, 1]} : vector<2x64x16xf32> to vector<1x64x16xf32>
    %35 = vector.shape_cast %34 : vector<1x64x16xf32> to vector<64x16xf32>
    %cst_19 = arith.constant dense<0.000000e+00> : vector<64x16xf32>
    %36 = tpu.matmul %32, %35, %cst_19 {dimension_numbers = #tpu.dot_dimension_numbers<[1], [0], [0], [1], [0, 0, 1, 1], [], []>} : vector<64x64xf32>, vector<64x16xf32>, vector<64x16xf32> -> vector<64x16xf32>
    %37 = vector.broadcast %33 : vector<64x1xf32> to vector<64x16xf32>
    %38 = arith.addf %36, %37 : vector<64x16xf32>
    %39 = vector.extract_strided_slice %31 {offsets = [1, 0, 0], sizes = [1, 64, 16], strides = [1, 1, 1]} : vector<2x64x16xf32> to vector<1x64x16xf32>
    %40 = vector.shape_cast %39 : vector<1x64x16xf32> to vector<64x16xf32>
    %cst_20 = arith.constant dense<0.000000e+00> : vector<64x16xf32>
    %41 = tpu.matmul %32, %40, %cst_20 {dimension_numbers = #tpu.dot_dimension_numbers<[1], [0], [0], [1], [0, 0, 1, 1], [], []>} : vector<64x64xf32>, vector<64x16xf32>, vector<64x16xf32> -> vector<64x16xf32>
    %42 = vector.broadcast %33 : vector<64x1xf32> to vector<64x16xf32>
    %43 = arith.addf %41, %42 : vector<64x16xf32>
    %44 = tpu.concatenate %38, %43 in 0 : vector<64x16xf32>, vector<64x16xf32> -> vector<128x16xf32>
    %45 = arith.mulf %29, %44 : vector<128x16xf32>
    %46 = arith.addf %45, %29 : vector<128x16xf32>
    %c0_21 = arith.constant 0 : index
    %c0_22 = arith.constant 0 : index
    %47 = vector.load %arg10[%c0_21, %c0_22] : memref<16x32xf32, #tpu.memory_space<vmem>>, vector<16x32xf32>
    %cst_23 = arith.constant dense<0.000000e+00> : vector<128x32xf32>
    %48 = tpu.matmul %46, %47, %cst_23 {dimension_numbers = #tpu.dot_dimension_numbers<[1], [0], [0], [1], [0, 0, 1, 1], [], []>} : vector<128x16xf32>, vector<16x32xf32>, vector<128x32xf32> -> vector<128x32xf32>
    %c0_24 = arith.constant 0 : index
    %c0_25 = arith.constant 0 : index
    %49 = vector.load %arg11[%c0_24, %c0_25] : memref<1x32xf32, #tpu.memory_space<vmem>>, vector<1x32xf32>
    %50 = vector.broadcast %49 : vector<1x32xf32> to vector<128x32xf32>
    %51 = arith.addf %48, %50 : vector<128x32xf32>
    %52 = arith.addf %1, %51 : vector<128x32xf32>
    %c0_26 = arith.constant 0 : index
    %c0_27 = arith.constant 0 : index
    %53 = vector.load %arg4[%c0_26, %c0_27] : memref<8x64xf32, #tpu.memory_space<vmem>>, vector<8x64xf32>
    %c0_28 = arith.constant 0 : index
    %c0_29 = arith.constant 0 : index
    %54 = vector.load %arg5[%c0_28, %c0_29] : memref<64x8xf32, #tpu.memory_space<vmem>>, vector<64x8xf32>
    %55 = vector.shape_cast %23 : vector<128x32xf32> to vector<2x64x32xf32>
    %56 = vector.extract_strided_slice %55 {offsets = [0, 0, 0], sizes = [1, 64, 32], strides = [1, 1, 1]} : vector<2x64x32xf32> to vector<1x64x32xf32>
    %57 = vector.shape_cast %56 : vector<1x64x32xf32> to vector<64x32xf32>
    %cst_30 = arith.constant dense<0.000000e+00> : vector<8x32xf32>
    %58 = tpu.matmul %53, %57, %cst_30 {dimension_numbers = #tpu.dot_dimension_numbers<[1], [0], [0], [1], [0, 0, 1, 1], [], []>} : vector<8x64xf32>, vector<64x32xf32>, vector<8x32xf32> -> vector<8x32xf32>
    %cst_31 = arith.constant dense<0.000000e+00> : vector<64x32xf32>
    %59 = tpu.matmul %54, %58, %cst_31 {dimension_numbers = #tpu.dot_dimension_numbers<[1], [0], [0], [1], [0, 0, 1, 1], [], []>} : vector<64x8xf32>, vector<8x32xf32>, vector<64x32xf32> -> vector<64x32xf32>
    %60 = vector.extract_strided_slice %55 {offsets = [1, 0, 0], sizes = [1, 64, 32], strides = [1, 1, 1]} : vector<2x64x32xf32> to vector<1x64x32xf32>
    %61 = vector.shape_cast %60 : vector<1x64x32xf32> to vector<64x32xf32>
    %cst_32 = arith.constant dense<0.000000e+00> : vector<8x32xf32>
    %62 = tpu.matmul %53, %61, %cst_32 {dimension_numbers = #tpu.dot_dimension_numbers<[1], [0], [0], [1], [0, 0, 1, 1], [], []>} : vector<8x64xf32>, vector<64x32xf32>, vector<8x32xf32> -> vector<8x32xf32>
    %cst_33 = arith.constant dense<0.000000e+00> : vector<64x32xf32>
    %63 = tpu.matmul %54, %62, %cst_33 {dimension_numbers = #tpu.dot_dimension_numbers<[1], [0], [0], [1], [0, 0, 1, 1], [], []>} : vector<64x8xf32>, vector<8x32xf32>, vector<64x32xf32> -> vector<64x32xf32>
    %64 = tpu.concatenate %59, %63 in 0 : vector<64x32xf32>, vector<64x32xf32> -> vector<128x32xf32>
    %cst_34 = arith.constant dense<0.000000e+00> : vector<128xf32>
    %65 = vector.multi_reduction <add>, %52, %cst_34 [1] : vector<128x32xf32> to vector<128xf32>
    %66 = vector.shape_cast %65 : vector<128xf32> to vector<128x1xf32>
    %cst_35 = arith.constant 3.200000e+01 : f32
    %67 = vector.broadcast %cst_35 : f32 to vector<128x1xf32>
    %68 = arith.divf %66, %67 : vector<128x1xf32>
    %69 = vector.broadcast %68 : vector<128x1xf32> to vector<128x32xf32>
    %70 = arith.subf %52, %69 : vector<128x32xf32>
    %71 = arith.mulf %70, %70 : vector<128x32xf32>
    %cst_36 = arith.constant dense<0.000000e+00> : vector<128xf32>
    %72 = vector.multi_reduction <add>, %71, %cst_36 [1] : vector<128x32xf32> to vector<128xf32>
    %73 = vector.shape_cast %72 : vector<128xf32> to vector<128x1xf32>
    %cst_37 = arith.constant 3.200000e+01 : f32
    %74 = vector.broadcast %cst_37 : f32 to vector<128x1xf32>
    %75 = arith.divf %73, %74 : vector<128x1xf32>
    %cst_38 = arith.constant 9.99999997E-7 : f32
    %76 = vector.broadcast %cst_38 : f32 to vector<128x1xf32>
    %77 = arith.addf %75, %76 : vector<128x1xf32>
    %78 = math.rsqrt %77 : vector<128x1xf32>
    %79 = vector.broadcast %78 : vector<128x1xf32> to vector<128x32xf32>
    %80 = arith.mulf %70, %79 : vector<128x32xf32>
    %81 = vector.broadcast %2 : vector<1x32xf32> to vector<128x32xf32>
    %82 = arith.mulf %80, %81 : vector<128x32xf32>
    %83 = vector.broadcast %3 : vector<1x32xf32> to vector<128x32xf32>
    %84 = arith.addf %82, %83 : vector<128x32xf32>
    %c0_39 = arith.constant 0 : index
    %c0_40 = arith.constant 0 : index
    %85 = vector.load %arg12[%c0_39, %c0_40] : memref<32x96xf32, #tpu.memory_space<vmem>>, vector<32x96xf32>
    %cst_41 = arith.constant dense<0.000000e+00> : vector<128x96xf32>
    %86 = tpu.matmul %84, %85, %cst_41 {dimension_numbers = #tpu.dot_dimension_numbers<[1], [0], [0], [1], [0, 0, 1, 1], [], []>} : vector<128x32xf32>, vector<32x96xf32>, vector<128x96xf32> -> vector<128x96xf32>
    %c0_42 = arith.constant 0 : index
    %c0_43 = arith.constant 0 : index
    %87 = vector.load %arg13[%c0_42, %c0_43] : memref<1x96xf32, #tpu.memory_space<vmem>>, vector<1x96xf32>
    %88 = vector.broadcast %87 : vector<1x96xf32> to vector<128x96xf32>
    %89 = arith.addf %86, %88 : vector<128x96xf32>
    %90 = vector.extract_strided_slice %89 {offsets = [0, 0], sizes = [128, 48], strides = [1, 1]} : vector<128x96xf32> to vector<128x48xf32>
    %91 = vector.extract_strided_slice %89 {offsets = [0, 48], sizes = [128, 48], strides = [1, 1]} : vector<128x96xf32> to vector<128x48xf32>
    %92 = arith.mulf %90, %91 : vector<128x48xf32>
    %93 = arith.addf %92, %90 : vector<128x48xf32>
    %c0_44 = arith.constant 0 : index
    %c0_45 = arith.constant 0 : index
    %94 = vector.load %arg14[%c0_44, %c0_45] : memref<48x32xf32, #tpu.memory_space<vmem>>, vector<48x32xf32>
    %cst_46 = arith.constant dense<0.000000e+00> : vector<128x32xf32>
    %95 = tpu.matmul %93, %94, %cst_46 {dimension_numbers = #tpu.dot_dimension_numbers<[1], [0], [0], [1], [0, 0, 1, 1], [], []>} : vector<128x48xf32>, vector<48x32xf32>, vector<128x32xf32> -> vector<128x32xf32>
    %c0_47 = arith.constant 0 : index
    %c0_48 = arith.constant 0 : index
    %96 = vector.load %arg15[%c0_47, %c0_48] : memref<1x32xf32, #tpu.memory_space<vmem>>, vector<1x32xf32>
    %97 = vector.broadcast %96 : vector<1x32xf32> to vector<128x32xf32>
    %98 = arith.addf %95, %97 : vector<128x32xf32>
    %99 = arith.addf %52, %98 : vector<128x32xf32>
    %100 = arith.addf %99, %64 : vector<128x32xf32>
    %101 = vector.shape_cast %100 : vector<128x32xf32> to vector<2x64x32xf32>
    %c0_49 = arith.constant 0 : index
    %c0_50 = arith.constant 0 : index
    %c0_51 = arith.constant 0 : index
    %102 = vector.load %arg16[%c0_49, %c0_50, %c0_51] : memref<2x64x32xf32, #tpu.memory_space<vmem>>, vector<2x64x32xf32>
    tpu.vector_store %arg16[%c0_49, %c0_50, %c0_51], %101 {strides = array<i32>} : memref<2x64x32xf32, #tpu.memory_space<vmem>>, vector<2x64x32xf32>,
    return
  }
  func.func @transform_0(%arg0: i32) -> (i32, i32, i32) {
    %c0_i32 = arith.constant 0 : i32
    %c0_i32_0 = arith.constant 0 : i32
    %c0_i32_1 = arith.constant 0 : i32
    return %arg0, %c0_i32, %c0_i32_0 : i32, i32, i32
  }
  func.func @transform_1(%arg0: i32) -> (i32, i32) {
    %c0_i32 = arith.constant 0 : i32
    %c0_i32_0 = arith.constant 0 : i32
    %c0_i32_1 = arith.constant 0 : i32
    return %c0_i32, %c0_i32_0 : i32, i32
  }
  func.func @transform_2(%arg0: i32) -> (i32, i32) {
    %c0_i32 = arith.constant 0 : i32
    %c0_i32_0 = arith.constant 0 : i32
    %c0_i32_1 = arith.constant 0 : i32
    return %c0_i32, %c0_i32_0 : i32, i32
  }
  func.func @transform_3(%arg0: i32) -> (i32, i32) {
    %c0_i32 = arith.constant 0 : i32
    %c0_i32_0 = arith.constant 0 : i32
    %c0_i32_1 = arith.constant 0 : i32
    return %c0_i32, %c0_i32_0 : i32, i32
  }
  func.func @transform_4(%arg0: i32) -> (i32, i32) {
    %c0_i32 = arith.constant 0 : i32
    %c0_i32_0 = arith.constant 0 : i32
    %c0_i32_1 = arith.constant 0 : i32
    return %c0_i32, %c0_i32_0 : i32, i32
  }
  func.func @transform_5(%arg0: i32) -> (i32, i32) {
    %c0_i32 = arith.constant 0 : i32
    %c0_i32_0 = arith.constant 0 : i32
    %c0_i32_1 = arith.constant 0 : i32
    return %c0_i32, %c0_i32_0 : i32, i32
  }
  func.func @transform_6(%arg0: i32) -> (i32, i32) {
    %c0_i32 = arith.constant 0 : i32
    %c0_i32_0 = arith.constant 0 : i32
    %c0_i32_1 = arith.constant 0 : i32
    return %c0_i32, %c0_i32_0 : i32, i32
  }
  func.func @transform_7(%arg0: i32) -> (i32, i32) {
    %c0_i32 = arith.constant 0 : i32
    %c0_i32_0 = arith.constant 0 : i32
    %c0_i32_1 = arith.constant 0 : i32
    return %c0_i32, %c0_i32_0 : i32, i32
  }
  func.func @transform_8(%arg0: i32) -> (i32, i32) {
    %c0_i32 = arith.constant 0 : i32
    %c0_i32_0 = arith.constant 0 : i32
    %c0_i32_1 = arith.constant 0 : i32
    return %c0_i32, %c0_i32_0 : i32, i32
  }
  func.func @transform_9(%arg0: i32) -> (i32, i32) {
    %c0_i32 = arith.constant 0 : i32
    %c0_i32_0 = arith.constant 0 : i32
    %c0_i32_1 = arith.constant 0 : i32
    return %c0_i32, %c0_i32_0 : i32, i32
  }
  func.func @transform_10(%arg0: i32) -> (i32, i32) {
    %c0_i32 = arith.constant 0 : i32
    %c0_i32_0 = arith.constant 0 : i32
    %c0_i32_1 = arith.constant 0 : i32
    return %c0_i32, %c0_i32_0 : i32, i32
  }
  func.func @transform_11(%arg0: i32) -> (i32, i32) {
    %c0_i32 = arith.constant 0 : i32
    %c0_i32_0 = arith.constant 0 : i32
    %c0_i32_1 = arith.constant 0 : i32
    return %c0_i32, %c0_i32_0 : i32, i32
  }
  func.func @transform_12(%arg0: i32) -> (i32, i32) {
    %c0_i32 = arith.constant 0 : i32
    %c0_i32_0 = arith.constant 0 : i32
    %c0_i32_1 = arith.constant 0 : i32
    return %c0_i32, %c0_i32_0 : i32, i32
  }
  func.func @transform_13(%arg0: i32) -> (i32, i32) {
    %c0_i32 = arith.constant 0 : i32
    %c0_i32_0 = arith.constant 0 : i32
    %c0_i32_1 = arith.constant 0 : i32
    return %c0_i32, %c0_i32_0 : i32, i32
  }
  func.func @transform_14(%arg0: i32) -> (i32, i32) {
    %c0_i32 = arith.constant 0 : i32
    %c0_i32_0 = arith.constant 0 : i32
    %c0_i32_1 = arith.constant 0 : i32
    return %c0_i32, %c0_i32_0 : i32, i32
  }
  func.func @transform_15(%arg0: i32) -> (i32, i32, i32) {
    %c0_i32 = arith.constant 0 : i32
    %c0_i32_0 = arith.constant 0 : i32
    %c0_i32_1 = arith.constant 0 : i32
    return %arg0, %c0_i32, %c0_i32_0 : i32, i32, i32
  }
}

</mosaic_0001>

<bundles_post_ra>
// kernel: tpu_custom_call.1
= control target key start
LH: loop header
LB: loop body
LE: loop exit
PB: predicated region body
PF: predicated region fallthrough
CT: control target
= control target key end

     0   :  { %vm68_vm0 = vcmask 261120   ;;  %s2911_s18 = smov 112   ;;  %vm614_vm1 = vcmask 523264   ;;  %vm2914_vm2 = vmmov 0   ;;  %vm1214_vm3 = vcmask 64512   ;;  %s4152_s0 = inlined_call_operand.vmem [shape: f32[2,64,32], index: 0, kind: input, shape index: {}]   ;;  %s4153_s5 = inlined_call_operand.vmem [shape: f32[32,32], index: 5, kind: input, shape index: {}]   ;;  %s4154_s1 = inlined_call_operand.vmem [shape: f32[1,32], index: 1, kind: input, shape index: {}]   ;;  %s4155_s2 = inlined_call_operand.vmem [shape: f32[1,32], index: 2, kind: input, shape index: {}]   ;;  %s4156_s6 = inlined_call_operand.vmem [shape: f32[1,32], index: 6, kind: input, shape index: {}]   ;;  %s4157_s7 = inlined_call_operand.vmem [shape: f32[64,64], index: 7, kind: input, shape index: {}]   ;;  %s4158_s8 = inlined_call_operand.vmem [shape: f32[64,1], index: 8, kind: input, shape index: {}]   ;;  %s4159_s9 = inlined_call_operand.vmem [shape: f32[16,32], index: 9, kind: input, shape index: {}]   ;;  %s4160_s3 = inlined_call_operand.vmem [shape: f32[8,64], index: 3, kind: input, shape index: {}]   ;;  %s4161_s4 = inlined_call_operand.vmem [shape: f32[64,8], index: 4, kind: input, shape index: {}]   ;;  %s4162_s10 = inlined_call_operand.vmem [shape: f32[1,32], index: 10, kind: input, shape index: {}]   ;;  %s4163_s11 = inlined_call_operand.vmem [shape: f32[32,96], index: 11, kind: input, shape index: {}]   ;;  %s4164_s13 = inlined_call_operand.vmem [shape: f32[48,32], index: 13, kind: input, shape index: {}]   ;;  %s4165_s12 = inlined_call_operand.vmem [shape: f32[1,96], index: 12, kind: input, shape index: {}]   ;;  %s4166_s14 = inlined_call_operand.vmem [shape: f32[1,32], index: 14, kind: input, shape index: {}]   ;;  %s4167_s15 = inlined_call_operand.vmem [shape: f32[2,64,32], index: 15, kind: output, shape index: {}]  }
   0x1   :  { %v50_v0 = vld [vmem:[%s4152_s0] sm:$0xff]  ;;  %v52_v1 = vld [vmem:[%s4152_s0 + $0x10] sm:$0xff]  ;;  %v51_v2 = vld [vmem:[%s4152_s0 + $0x8] sm:$0xff]  ;;  %vm922_vm4 = vcmask 130048   ;;  %vm2072_vm5 = vcmask 392192  }
   0x2   :  { %v69_v3 = vsel %vm68_vm0, %v50_v0, 0.0  ;;  %v75_v4 = vsel %vm68_vm0, %v52_v1, 0.0  ;;  %v53_v5 = vld [vmem:[%s4152_s0 + $0x18] sm:$0xff]  ;;  %v72_v6 = vsel %vm68_vm0, %v51_v2, 0.0  ;;  %v54_v8 = vld [vmem:[%s4152_s0 + $0x20] sm:$0xff]  ;;  %v55_v9 = vld [vmem:[%s4152_s0 + $0x28] sm:$0xff] }
   0x3   :  { %70 = vadd.xlane.f32.xlu0 %v69_v3  ;;  %76 = vadd.xlane.f32.xlu1 %v75_v4  ;;  %v78_v7 = vsel %vm68_vm0, %v53_v5, 0.0  ;;  %v81_v10 = vsel %vm68_vm0, %v54_v8, 0.0  ;;  %v84_v11 = vsel %vm68_vm0, %v55_v9, 0.0  ;;  %v3023_v12 = vld [vmem:[%s4152_s0 + $0x30] sm:$0xff]  ;;  %v3028_v13 = vld [vmem:[%s4152_s0 + $0x38] sm:$0xff]  ;;  %v3037_v16 = vld [vmem:[%s4152_s0 + $0x40] sm:$0xff] }
   0x4   :  { %v87_v14 = vsel %vm68_vm0, %v3023_v12, 0.0  ;;  %v90_v15 = vsel %vm68_vm0, %v3028_v13, 0.0  ;;  %v3042_v17 = vld [vmem:[%s4152_s0 + $0x48] sm:$0xff]  ;;  %v93_v18 = vsel %vm68_vm0, %v3037_v16, 0.0  ;;  %v3051_v20 = vld [vmem:[%s4152_s0 + $0x50] sm:$0xff]  ;;  %v3056_v21 = vld [vmem:[%s4152_s0 + $0x58] sm:$0xff] }
   0x5   :  { %v96_v19 = vsel %vm68_vm0, %v3042_v17, 0.0  ;;  %v99_v22 = vsel %vm68_vm0, %v3051_v20, 0.0  ;;  %v102_v23 = vsel %vm68_vm0, %v3056_v21, 0.0  ;;  %v3065_v24 = vld [vmem:[%s4152_s0 + $0x60] sm:$0xff]  ;;  %v3070_v25 = vld [vmem:[%s4152_s0 + $0x68] sm:$0xff]  ;;  %v3079_v28 = vld [vmem:[%s4152_s0 + $0x70] sm:$0xff] }
   0x6   :  { %v105_v26 = vsel %vm68_vm0, %v3065_v24, 0.0  ;;  %v108_v27 = vsel %vm68_vm0, %v3070_v25, 0.0  ;;  %v3084_v29 = vld [vmem:[%s4152_s0 + $0x78] sm:$0xff]  ;;  %v111_v30 = vsel %vm68_vm0, %v3079_v28, 0.0 }
   0x7   :  { %73 = vadd.xlane.f32.xlu0 %v72_v6  ;;  %79 = vadd.xlane.f32.xlu1 %v78_v7  ;;  %v114_v31 = vsel %vm68_vm0, %v3084_v29, 0.0 }
   0xb   :  { %82 = vadd.xlane.f32.xlu0 %v81_v10  ;;  %85 = vadd.xlane.f32.xlu1 %v84_v11 }
   0xf   :  { %88 = vadd.xlane.f32.xlu0 %v87_v14  ;;  %91 = vadd.xlane.f32.xlu1 %v90_v15 }
  0x13   :  { %94 = vadd.xlane.f32.xlu0 %v93_v18  ;;  %97 = vadd.xlane.f32.xlu1 %v96_v19 }
  0x17   :  { %100 = vadd.xlane.f32.xlu0 %v99_v22  ;;  %103 = vadd.xlane.f32.xlu1 %v102_v23 }
  0x1b   :  { %106 = vadd.xlane.f32.xlu0 %v105_v26  ;;  %109 = vadd.xlane.f32.xlu1 %v108_v27 }
  0x1f   :  { %112 = vadd.xlane.f32.xlu0 %v111_v30  ;;  %115 = vadd.xlane.f32.xlu1 %v114_v31 }
  0x8c   :  { %v71_v32 = vpop.xlane.xlu0 %70  ;;  %v77_v33 = vpop.xlane.xlu1 %76 }
  0x8d   :  { %v118_v34 = vmul.f32 0.03125, %v71_v32  ;;  %v120_v35 = vmul.f32 0.03125, %v77_v33 }
  0x8f   :  { %v3090_v36 = vsub.f32 %v50_v0, %v118_v34  ;;  %v3092_v37 = vsub.f32 %v52_v1, %v120_v35 }
  0x90   :  { %v74_v38 = vpop.xlane.xlu0 %73  ;;  %v80_v39 = vpop.xlane.xlu1 %79 }
  0x91   :  { %v119_v40 = vmul.f32 0.03125, %v74_v38  ;;  %v121_v41 = vmul.f32 0.03125, %v80_v39  ;;  %v150_v42 = vmul.f32 %v3090_v36, %v3090_v36  ;;  %v152_v43 = vmul.f32 %v3092_v37, %v3092_v37 }
  0x93   :  { %v3098_v44 = vsub.f32 %v51_v2, %v119_v40  ;;  %v3100_v45 = vsub.f32 %v53_v5, %v121_v41  ;;  %v166_v46 = vsel %vm68_vm0, %v150_v42, 0.0  ;;  %v172_v49 = vsel %vm68_vm0, %v152_v43, 0.0 }
  0x94   :  { %167 = vadd.xlane.f32.xlu0 %v166_v46  ;;  %v83_v47 = vpop.xlane.xlu0 %82  ;;  %v86_v48 = vpop.xlane.xlu1 %85 }
  0x95   :  { %v122_v50 = vmul.f32 0.03125, %v83_v47  ;;  %v123_v51 = vmul.f32 0.03125, %v86_v48  ;;  %v151_v52 = vmul.f32 %v3098_v44, %v3098_v44  ;;  %v153_v53 = vmul.f32 %v3100_v45, %v3100_v45 }
  0x97   :  { %v3108_v54 = vsub.f32 %v54_v8, %v122_v50  ;;  %v3110_v55 = vsub.f32 %v55_v9, %v123_v51  ;;  %v169_v56 = vsel %vm68_vm0, %v151_v52, 0.0  ;;  %v175_v59 = vsel %vm68_vm0, %v153_v53, 0.0  ;;  %v324_v53 = vld [vmem:[%s4153_s5 + $0x10] sm:$0xff] }
  0x98   :  { %173 = vadd.xlane.f32.xlu0 %v172_v49  ;;  %170 = vadd.xlane.f32.xlu1 %v169_v56  ;;  %v89_v57 = vpop.xlane.xlu0 %88  ;;  %v92_v58 = vpop.xlane.xlu1 %91  ;;  %v323_v56 = vld [vmem:[%s4153_s5 + $0x8] sm:$0xff] }
  0x99   :  { %v124_v60 = vmul.f32 0.03125, %v89_v57  ;;  %v125_v61 = vmul.f32 0.03125, %v92_v58  ;;  %v154_v62 = vmul.f32 %v3108_v54, %v3108_v54  ;;  %v155_v63 = vmul.f32 %v3110_v55, %v3110_v55  ;;  %v322_v57 = vld [vmem:[%s4153_s5] sm:$0xff] }
  0x9b   :  { %v3119_v0 = vsub.f32 %v3023_v12, %v124_v60  ;;  %v3122_v1 = vsub.f32 %v3028_v13, %v125_v61  ;;  %v178_v2 = vsel %vm68_vm0, %v154_v62, 0.0  ;;  %v181_v5 = vsel %vm68_vm0, %v155_v63, 0.0 }
  0x9c   :  { %176 = vadd.xlane.f32.xlu1 %v175_v59  ;;  %179 = vadd.xlane.f32.xlu0 %v178_v2  ;;  %v95_v3 = vpop.xlane.xlu0 %94  ;;  %v98_v4 = vpop.xlane.xlu1 %97 }
  0x9d   :  { %v126_v6 = vmul.f32 0.03125, %v95_v3  ;;  %v127_v7 = vmul.f32 0.03125, %v98_v4  ;;  %v156_v8 = vmul.f32 %v3119_v0, %v3119_v0  ;;  %v157_v9 = vmul.f32 %v3122_v1, %v3122_v1 }
  0x9f   :  { %v3131_v10 = vsub.f32 %v3037_v16, %v126_v6  ;;  %v3134_v11 = vsub.f32 %v3042_v17, %v127_v7  ;;  %v184_v12 = vsel %vm68_vm0, %v156_v8, 0.0  ;;  %v187_v15 = vsel %vm68_vm0, %v157_v9, 0.0 }
  0xa0   :  { %182 = vadd.xlane.f32.xlu1 %v181_v5  ;;  %185 = vadd.xlane.f32.xlu0 %v184_v12  ;;  %v101_v13 = vpop.xlane.xlu0 %100  ;;  %v104_v14 = vpop.xlane.xlu1 %103 }
  0xa1   :  { %v128_v18 = vmul.f32 0.03125, %v101_v13  ;;  %v129_v19 = vmul.f32 0.03125, %v104_v14  ;;  %v158_v22 = vmul.f32 %v3131_v10, %v3131_v10  ;;  %v159_v16 = vmul.f32 %v3134_v11, %v3134_v11 }
  0xa3   :  { %v3143_v23 = vsub.f32 %v3051_v20, %v128_v18  ;;  %v3146_v17 = vsub.f32 %v3056_v21, %v129_v19  ;;  %v190_v26 = vsel %vm68_vm0, %v158_v22, 0.0  ;;  %v193_v31 = vsel %vm68_vm0, %v159_v16, 0.0 }
  0xa4   :  { %188 = vadd.xlane.f32.xlu1 %v187_v15  ;;  %191 = vadd.xlane.f32.xlu0 %v190_v26  ;;  %v107_v27 = vpop.xlane.xlu0 %106  ;;  %v110_v30 = vpop.xlane.xlu1 %109 }
  0xa5   :  { %v130_v32 = vmul.f32 0.03125, %v107_v27  ;;  %v131_v33 = vmul.f32 0.03125, %v110_v30  ;;  %v160_v34 = vmul.f32 %v3143_v23, %v3143_v23  ;;  %v161_v20 = vmul.f32 %v3146_v17, %v3146_v17 }
  0xa7   :  { %v3155_v35 = vsub.f32 %v3065_v24, %v130_v32  ;;  %v3158_v21 = vsub.f32 %v3070_v25, %v131_v33  ;;  %v196_v38 = vsel %vm68_vm0, %v160_v34, 0.0  ;;  %v199_v41 = vsel %vm68_vm0, %v161_v20, 0.0  ;;  %v3195_v32 = vld [vmem:[%s4154_s1] ss:$0 sm:$0xff] }
  0xa8   :  { %194 = vadd.xlane.f32.xlu1 %v193_v31  ;;  %197 = vadd.xlane.f32.xlu0 %v196_v38  ;;  %v113_v39 = vpop.xlane.xlu0 %112  ;;  %v116_v40 = vpop.xlane.xlu1 %115 }
  0xa9   :  { %v132_v42 = vmul.f32 0.03125, %v113_v39  ;;  %v133_v43 = vmul.f32 0.03125, %v116_v40  ;;  %v162_v46 = vmul.f32 %v3155_v35, %v3155_v35  ;;  %v163_v24 = vmul.f32 %v3158_v21, %v3158_v21  ;;  %v3201_v40 = vld [vmem:[%s4155_s2] ss:$0 sm:$0xff] }
  0xab   :  { %v3167_v47 = vsub.f32 %v3079_v28, %v132_v42  ;;  %v3170_v25 = vsub.f32 %v3084_v29, %v133_v43  ;;  %v202_v48 = vsel %vm68_vm0, %v162_v46, 0.0  ;;  %v205_v49 = vsel %vm68_vm0, %v163_v24, 0.0  ;;  %v325_v29 = vld [vmem:[%s4153_s5 + $0x18] sm:$0xff] }
  0xac   :  { %200 = vadd.xlane.f32.xlu1 %v199_v41  ;;  %203 = vadd.xlane.f32.xlu0 %v202_v48 }
  0xad   :  { %v164_v50 = vmul.f32 %v3167_v47, %v3167_v47  ;;  %v165_v51 = vmul.f32 %v3170_v25, %v3170_v25  ;;  %2570 = vmatprep.subr.mxu0 %v325_v29 }
  0xae   :  { %2571 = vmatpush3.msra.mxu0 %v325_v29 }
  0xaf   :  { %v208_v52 = vsel %vm68_vm0, %v164_v50, 0.0  ;;  %v211_v28 = vsel %vm68_vm0, %v165_v51, 0.0  ;;  %2572 = vmatprep.subr.mxu0 %v324_v53 }
  0xb0   :  { %206 = vadd.xlane.f32.xlu1 %v205_v49  ;;  %209 = vadd.xlane.f32.xlu0 %v208_v52 }
  0xb1   :  { %2573 = vmatpush3.msra.mxu0 %v324_v53 }
  0xb2   :  { %2574 = vmatprep.subr.mxu0 %v323_v56 }
  0xb3   :  { %2575 = vmatpush3.msra.mxu0 %v323_v56 }
  0xb4   :  { %212 = vadd.xlane.f32.xlu1 %v211_v28  ;;  %2576 = vmatprep.subr.mxu0 %v322_v57 }
  0xb5   :  { %2577 = vmatpush3.msra.mxu0 %v322_v57 }
 0x11d   :  { %v168_v58 = vpop.xlane.xlu0 %167 }
 0x11e   :  { %v214_v59 = vmul.f32 0.03125, %v168_v58 }
 0x120   :  { %v230_v60 = vadd.f32 1e-06, %v214_v59 }
 0x121   :  { %v171_v61 = vpop.xlane.xlu1 %170  ;;  %v174_v62 = vpop.xlane.xlu0 %173 }
 0x122   :  { %2829 = vrsqrt.f32 %v230_v60  ;;  %v215_v63 = vmul.f32 0.03125, %v171_v61  ;;  %v216_v2 = vmul.f32 0.03125, %v174_v62 }
 0x124   :  { %v231_v3 = vadd.f32 1e-06, %v215_v63  ;;  %v232_v4 = vadd.f32 1e-06, %v216_v2 }
 0x125   :  { %v177_v5 = vpop.xlane.xlu1 %176  ;;  %v180_v6 = vpop.xlane.xlu0 %179 }
 0x126   :  { %2831 = vrsqrt.f32 %v231_v3  ;;  %v217_v7 = vmul.f32 0.03125, %v177_v5  ;;  %v218_v8 = vmul.f32 0.03125, %v180_v6 }
 0x127   :  { %2833 = vrsqrt.f32 %v232_v4 }
 0x128   :  { %v233_v9 = vadd.f32 1e-06, %v217_v7  ;;  %v234_v12 = vadd.f32 1e-06, %v218_v8 }
 0x129   :  { %v183_v13 = vpop.xlane.xlu1 %182  ;;  %v186_v14 = vpop.xlane.xlu0 %185 }
 0x12a   :  { %2835 = vrsqrt.f32 %v233_v9  ;;  %v219_v15 = vmul.f32 0.03125, %v183_v13  ;;  %v220_v18 = vmul.f32 0.03125, %v186_v14 }
 0x12b   :  { %2837 = vrsqrt.f32 %v234_v12 }
 0x12c   :  { %v235_v19 = vadd.f32 1e-06, %v219_v15  ;;  %v236_v22 = vadd.f32 1e-06, %v220_v18 }
 0x12d   :  { %v189_v16 = vpop.xlane.xlu1 %188  ;;  %v192_v26 = vpop.xlane.xlu0 %191 }
 0x12e   :  { %2839 = vrsqrt.f32 %v235_v19  ;;  %v221_v27 = vmul.f32 0.03125, %v189_v16  ;;  %v222_v30 = vmul.f32 0.03125, %v192_v26 }
 0x12f   :  { %v2830_v31 = vpop.eup %2829  ;;  %2841 = vrsqrt.f32 %v236_v22 }
 0x130   :  { %v237_v33 = vadd.f32 1e-06, %v221_v27  ;;  %v238_v34 = vadd.f32 1e-06, %v222_v30  ;;  %v262_v20 = vmul.f32 %v2830_v31, %v3090_v36 }
 0x131   :  { %v195_v38 = vpop.xlane.xlu1 %194  ;;  %v198_v39 = vpop.xlane.xlu0 %197 }
 0x132   :  { %2843 = vrsqrt.f32 %v237_v33  ;;  %v223_v41 = vmul.f32 0.03125, %v195_v38  ;;  %v224_v42 = vmul.f32 0.03125, %v198_v39  ;;  %v284_v43 = vmul.f32 %v3195_v32, %v262_v20 }
 0x133   :  { %v2832_v46 = vpop.eup %2831  ;;  %2845 = vrsqrt.f32 %v238_v34 }
 0x134   :  { %v2834_v24 = vpop.eup %2833  ;;  %v239_v48 = vadd.f32 1e-06, %v223_v41  ;;  %v240_v49 = vadd.f32 1e-06, %v224_v42  ;;  %v3205_v50 = vadd.f32 %v3201_v40, %v284_v43  ;;  %v263_v36 = vmul.f32 %v2832_v46, %v3098_v44 }
 0x135   :  { %v201_v51 = vpop.xlane.xlu1 %200  ;;  %v204_v52 = vpop.xlane.xlu0 %203  ;;  %v264_v28 = vmul.f32 %v2834_v24, %v3092_v37 }
 0x136   :  { %2847 = vrsqrt.f32 %v239_v48  ;;  %v225_v29 = vmul.f32 0.03125, %v201_v51  ;;  %v226_v53 = vmul.f32 0.03125, %v204_v52  ;;  %2578 = vmatprep.mubr.msk.f32.mxu0 %vm68_vm0, %v3205_v50  ;;  %v285_v56 = vmul.f32 %v3195_v32, %v263_v36 }
 0x137   :  { %v2836_v57 = vpop.eup %2835  ;;  %2849 = vrsqrt.f32 %v240_v49  ;;  %v286_v58 = vmul.f32 %v3195_v32, %v264_v28 }
 0x138   :  { %v2838_v59 = vpop.eup %2837  ;;  %v241_v60 = vadd.f32 1e-06, %v225_v29  ;;  %v242_v61 = vadd.f32 1e-06, %v226_v53  ;;  %v3214_v44 = vadd.f32 %v3201_v40, %v285_v56  ;;  %v265_v37 = vmul.f32 %v2836_v57, %v3100_v45 }
 0x139   :  { %v207_v62 = vpop.xlane.xlu1 %206  ;;  %v210_v63 = vpop.xlane.xlu0 %209  ;;  %v3218_v2 = vadd.f32 %v3201_v40, %v286_v58  ;;  %v266_v3 = vmul.f32 %v2838_v59, %v3108_v54 }
 0x13a   :  { %2851 = vrsqrt.f32 %v241_v60  ;;  %v227_v4 = vmul.f32 0.03125, %v207_v62  ;;  %v228_v5 = vmul.f32 0.03125, %v210_v63  ;;  %2579 = vmatmul.mubr.msk.f32.vlgmr.msra.gmra.mxu0 %vm68_vm0, %v3214_v44  ;;  %v287_v6 = vmul.f32 %v3195_v32, %v265_v37 }
 0x13b   :  { %v2840_v7 = vpop.eup %2839  ;;  %2853 = vrsqrt.f32 %v242_v61  ;;  %2581 = vmatprep.mubr.msk.f32.mxu0 %vm68_vm0, %v3218_v2  ;;  %v288_v45 = vmul.f32 %v3195_v32, %v266_v3 }
 0x13c   :  { %v2842_v8 = vpop.eup %2841  ;;  %v243_v9 = vadd.f32 1e-06, %v227_v4  ;;  %v244_v12 = vadd.f32 1e-06, %v228_v5  ;;  %v3228_v54 = vadd.f32 %v3201_v40, %v287_v6  ;;  %v267_v13 = vmul.f32 %v2840_v7, %v3110_v55  ;;  %v2320_v4 = vld [vmem:[%s4156_s6] ss:$0 sm:$0xff] }
 0x13d   :  { %v213_v14 = vpop.xlane.xlu1 %212  ;;  %v3232_v15 = vadd.f32 %v3201_v40, %v288_v45  ;;  %v268_v18 = vmul.f32 %v2842_v8, %v3119_v0 }
 0x13e   :  { %2855 = vrsqrt.f32 %v243_v9  ;;  %v229_v19 = vmul.f32 0.03125, %v213_v14  ;;  %2582 = vmatmul.mubr.msk.f32.gmra.mxu0 %vm68_vm0, %v3228_v54  ;;  %v289_v22 = vmul.f32 %v3195_v32, %v267_v13  ;;  %v3334_v13 = vld [vmem:[%s4157_s7] sm:$0xff] }
 0x13f   :  { %v2844_v16 = vpop.eup %2843  ;;  %2857 = vrsqrt.f32 %v244_v12  ;;  %2584 = vmatprep.mubr.msk.f32.mxu0 %vm68_vm0, %v3232_v15  ;;  %v290_v55 = vmul.f32 %v3195_v32, %v268_v18  ;;  %2618 = vmatprep.mubr.msk.f32.mxu1 %vm614_vm1, %v3334_v13 }
 0x140   :  { %v2846_v26 = vpop.eup %2845  ;;  %v245_v27 = vadd.f32 1e-06, %v229_v19  ;;  %v3242_v30 = vadd.f32 %v3201_v40, %v289_v22  ;;  %v269_v0 = vmul.f32 %v2844_v16, %v3122_v1 }
 0x141   :  { %v3246_v31 = vadd.f32 %v3201_v40, %v290_v55  ;;  %v270_v33 = vmul.f32 %v2846_v26, %v3131_v10 }
 0x142   :  { %2859 = vrsqrt.f32 %v245_v27  ;;  %2585 = vmatmul.mubr.msk.f32.gmra.mxu0 %vm68_vm0, %v3242_v30  ;;  %v291_v34 = vmul.f32 %v3195_v32, %v269_v0 }
 0x143   :  { %v2848_v20 = vpop.eup %2847  ;;  %2587 = vmatprep.mubr.msk.f32.mxu0 %vm68_vm0, %v3246_v31  ;;  %v292_v38 = vmul.f32 %v3195_v32, %v270_v33 }
 0x144   :  { %v2850_v39 = vpop.eup %2849  ;;  %v3256_v1 = vadd.f32 %v3201_v40, %v291_v34  ;;  %v271_v41 = vmul.f32 %v2848_v20, %v3134_v11 }
 0x145   :  { %v3260_v10 = vadd.f32 %v3201_v40, %v292_v38  ;;  %v272_v42 = vmul.f32 %v2850_v39, %v3143_v23 }
 0x146   :  { %2588 = vmatmul.mubr.msk.f32.gmra.mxu0 %vm68_vm0, %v3256_v1  ;;  %v293_v43 = vmul.f32 %v3195_v32, %v271_v41 }
 0x147   :  { %v2852_v46 = vpop.eup %2851  ;;  %2590 = vmatprep.mubr.msk.f32.mxu0 %vm68_vm0, %v3260_v10  ;;  %v294_v24 = vmul.f32 %v3195_v32, %v272_v42 }
 0x148   :  { %v2854_v48 = vpop.eup %2853  ;;  %v3270_v49 = vadd.f32 %v3201_v40, %v293_v43  ;;  %v273_v11 = vmul.f32 %v2852_v46, %v3146_v17 }
 0x149   :  { %v3274_v36 = vadd.f32 %v3201_v40, %v294_v24  ;;  %v274_v23 = vmul.f32 %v2854_v48, %v3155_v35  ;;  %v2912_v48 = vmov 0  }
 0x14a   :  { %2591 = vmatmul.mubr.msk.f32.gmra.mxu0 %vm68_vm0, %v3270_v49  ;;  %v295_v51 = vmul.f32 %v3195_v32, %v273_v11  ;;  %2828 = vset.pattern.permute.xlu1 %v2912_v48  ;;  %v534_v11 = vld [vmem:[%s4158_s8] sm:$0xff] }
 0x14b   :  { %v2856_v52 = vpop.eup %2855  ;;  %2593 = vmatprep.mubr.msk.f32.mxu0 %vm68_vm0, %v3274_v36  ;;  %v296_v28 = vmul.f32 %v3195_v32, %v274_v23  ;;  %2827 = vset.pattern.permute.xlu0 %v2912_v48  ;;  %v535_v23 = vld [vmem:[%s4158_s8 + $0x8] sm:$0xff]  ;;  %v533_v48 = vld [vmem:[%s4157_s7 + $0x38] sm:$0xff] }
 0x14c   :  { %v2858_v29 = vpop.eup %2857  ;;  %v3284_v53 = vadd.f32 %v3201_v40, %v295_v51  ;;  %v275_v17 = vmul.f32 %v2856_v52, %v3158_v21  ;;  %v537_v51 = vld [vmem:[%s4158_s8 + $0x18] sm:$0xff]  ;;  %v536_v52 = vld [vmem:[%s4158_s8 + $0x10] sm:$0xff] }
 0x14d   :  { %v3288_v56 = vadd.f32 %v3201_v40, %v296_v28  ;;  %v276_v35 = vmul.f32 %v2858_v29, %v3167_v47  ;;  %v914_v28 = vld [vmem:[%s4159_s9 + $0x8] sm:$0xff]  ;;  %v913_v29 = vld [vmem:[%s4159_s9] sm:$0xff]  ;;  %s2915_s9 = smov 80  }
 0x14e   :  { %2594 = vmatmul.mubr.msk.f32.gmra.mxu0 %vm68_vm0, %v3284_v53  ;;  %v297_v57 = vmul.f32 %v3195_v32, %v275_v17  ;;  %2658 = vmatprep.subr.mxu0 %v914_v28  ;;  %v539_v17 = vld [vmem:[%s4158_s8 + $0x28] sm:$0xff] }
 0x14f   :  { %v2860_v58 = vpop.eup %2859  ;;  %2596 = vmatprep.mubr.msk.f32.mxu0 %vm68_vm0, %v3288_v56  ;;  %v298_v59 = vmul.f32 %v3195_v32, %v276_v35  ;;  %2659 = vmatpush3.msra.mxu0 %v914_v28  ;;  %v538_v35 = vld [vmem:[%s4158_s8 + $0x20] sm:$0xff] }
 0x150   :  { %v3298_v60 = vadd.f32 %v3201_v40, %v297_v57  ;;  %v277_v21 = vmul.f32 %v2860_v58, %v3170_v25  ;;  %2660 = vmatprep.subr.mxu0 %v913_v29  ;;  %v541_v57 = vld [vmem:[%s4158_s8 + $0x38] sm:$0xff]  ;;  %v540_v58 = vld [vmem:[%s4158_s8 + $0x30] sm:$0xff] }
 0x151   :  { %v3302_v61 = vadd.f32 %v3201_v40, %v298_v59  ;;  %2661 = vmatpush3.msra.mxu0 %v913_v29 }
 0x152   :  { %2597 = vmatmul.mubr.msk.f32.gmra.mxu0 %vm68_vm0, %v3298_v60  ;;  %v299_v47 = vmul.f32 %v3195_v32, %v277_v21 }
 0x153   :  { %2599 = vmatprep.mubr.msk.f32.mxu0 %vm68_vm0, %v3302_v61 }
 0x154   :  { %v3310_v37 = vadd.f32 %v3201_v40, %v299_v47 }
 0x156   :  { %2600 = vmatmul.mubr.msk.f32.gmra.mxu0 %vm68_vm0, %v3310_v37 }
 0x1fa   :  { %v2580_v62 = vpop.f32.mrf.mxu0 }
 0x1fb   :  { %v3342_v22 = vadd.f32 %v2580_v62, %v2320_v4 }
 0x1fc   :  { %v447_v63 = vpop.f32.mrf.mxu0 }
 0x1fd   :  { %v3352_v0 = vadd.f32 %v2320_v4, %v447_v63 }
 0x1fe   :  { %v2583_v25 = vpop.f32.mrf.mxu0 }
 0x1ff   :  { %v3327_v12 = vadd.f32 %v2583_v25, %v2320_v4 }
 0x200   :  { %v457_v3 = vpop.f32.mrf.mxu0 }
 0x201   :  { %v3346_v55 = vadd.f32 %v2320_v4, %v457_v3 }
 0x202   :  { %v2586_v5 = vpop.f32.mrf.mxu0 }
 0x203   :  { %v3317_v6 = vadd.f32 %v2586_v5, %v2320_v4  ;;  %v527_v5 = vld [vmem:[%s4157_s7 + $0x8] sm:$0xff] }
 0x204   :  { %v467_v32 = vpop.f32.mrf.mxu0 }
 0x205   :  { %600 = vrot.lane.b32.xlu1 %v3317_v6, %s2911_s18  ;;  %v3338_v18 = vadd.f32 %v2320_v4, %v467_v32  ;;  %v528_v32 = vld [vmem:[%s4157_s7 + $0x10] sm:$0xff] }
 0x206   :  { %v2589_v40 = vpop.f32.mrf.mxu0 }
 0x207   :  { %v3321_v7 = vadd.f32 %v2589_v40, %v2320_v4 }
 0x208   :  { %v477_v45 = vpop.f32.mrf.mxu0 }
 0x209   :  { %v3323_v8 = vadd.f32 %v2320_v4, %v477_v45  ;;  %604 = vrot.lane.b32.xlu0 %v3321_v7, %s2911_s18 }
 0x20a   :  { %v2592_v9 = vpop.f32.mrf.mxu0 }
 0x20b   :  { %602 = vrot.lane.b32.xlu1 %v3323_v8, %s2911_s18  ;;  %v3378_v46 = vadd.f32 %v2592_v9, %v2320_v4  ;;  %v529_v9 = vld [vmem:[%s4157_s7 + $0x18] sm:$0xff] }
 0x20c   :  { %v487_v14 = vpop.f32.mrf.mxu0 }
 0x20d   :  { %596 = vrot.lane.b32.xlu0 %v3327_v12, %s2911_s18  ;;  %v3382_v24 = vadd.f32 %v2320_v4, %v487_v14  ;;  %v530_v14 = vld [vmem:[%s4157_s7 + $0x20] sm:$0xff] }
 0x20e   :  { %v2595_v19 = vpop.f32.mrf.mxu0 }
 0x20f   :  { %598 = vrot.lane.b32.xlu1 %v3338_v18, %s2911_s18  ;;  %v3370_v42 = vadd.f32 %v2595_v19, %v2320_v4 }
 0x210   :  { %v497_v16 = vpop.f32.mrf.mxu0 }
 0x211   :  { %592 = vrot.lane.b32.xlu0 %v3342_v22, %s2911_s18  ;;  %v3374_v43 = vadd.f32 %v2320_v4, %v497_v16 }
 0x212   :  { %v2598_v26 = vpop.f32.mrf.mxu0 }
 0x213   :  { %594 = vrot.lane.b32.xlu1 %v3346_v55, %s2911_s18  ;;  %v3362_v39 = vadd.f32 %v2598_v26, %v2320_v4  ;;  %v531_v26 = vld [vmem:[%s4157_s7 + $0x28] sm:$0xff] }
 0x214   :  { %v507_v27 = vpop.f32.mrf.mxu0 }
 0x215   :  { %v3366_v41 = vadd.f32 %v2320_v4, %v507_v27  ;;  %v532_v27 = vld [vmem:[%s4157_s7 + $0x30] sm:$0xff] }
 0x216   :  { %v2601_v33 = vpop.f32.mrf.mxu0 }
 0x217   :  { %v3354_v34 = vadd.f32 %v2601_v33, %v2320_v4  ;;  %590 = vrot.lane.b32.xlu1 %v3352_v0, %s2911_s18 }
 0x218   :  { %v517_v20 = vpop.f32.mrf.mxu0 }
 0x219   :  { %v3358_v38 = vadd.f32 %v2320_v4, %v517_v20  ;;  %766 = vrot.lane.b32.xlu0 %v3354_v34, %s2911_s18 }
 0x21b   :  { %764 = vrot.lane.b32.xlu1 %v3358_v38, %s2911_s18 }
 0x21d   :  { %762 = vrot.lane.b32.xlu0 %v3362_v39, %s2911_s18 }
 0x21f   :  { %760 = vrot.lane.b32.xlu1 %v3366_v41, %s2911_s18 }
 0x221   :  { %758 = vrot.lane.b32.xlu0 %v3370_v42, %s2911_s18 }
 0x223   :  { %756 = vrot.lane.b32.xlu1 %v3374_v43, %s2911_s18 }
 0x225   :  { %754 = vrot.lane.b32.xlu0 %v3378_v46, %s2911_s18 }
 0x227   :  { %752 = vrot.lane.b32.xlu1 %v3382_v24, %s2911_s18 }
 0x229   :  { %544 = vperm.xlu0 %2827, %v534_v11  }
 0x22b   :  { %549 = vperm.xlu1 %2828, %v535_v23  }
 0x22d   :  { %559 = vperm.xlu0 %2827, %v537_v51   ;;  %v2913_v51 = vmov 0.0  }
 0x22f   :  { %554 = vperm.xlu1 %2828, %v536_v52  }
 0x231   :  { %569 = vperm.xlu0 %2827, %v539_v17  }
 0x233   :  { %564 = vperm.xlu1 %2828, %v538_v35  }
 0x235   :  { %579 = vperm.xlu0 %2827, %v541_v57  }
 0x237   :  { %574 = vperm.xlu1 %2828, %v540_v58  }
 0x277   :  { %v601_v59 = vpop.permute.xlu1 %600 }
 0x27b   :  { %v605_v21 = vpop.permute.xlu0 %604 }
 0x27c   :  { %2602 = vmatprep.subr.mxu1 %v605_v21 }
 0x27d   :  { %v603_v47 = vpop.permute.xlu1 %602  ;;  %2603 = vmatpush3.msra.mxu1 %v605_v21 }
 0x27e   :  { %2604 = vmatprep.subr.mxu1 %v603_v47 }
 0x27f   :  { %2605 = vmatpush3.msra.mxu1 %v603_v47  ;;  %v597_v62 = vpop.permute.xlu0 %596 }
 0x280   :  { %2606 = vmatprep.subr.mxu1 %v601_v59 }
 0x281   :  { %v599_v63 = vpop.permute.xlu1 %598  ;;  %2607 = vmatpush3.msra.mxu1 %v601_v59 }
 0x282   :  { %2608 = vmatprep.subr.mxu1 %v599_v63 }
 0x283   :  { %2609 = vmatpush3.msra.mxu1 %v599_v63  ;;  %v593_v3 = vpop.permute.xlu0 %592 }
 0x284   :  { %2610 = vmatprep.subr.mxu1 %v597_v62 }
 0x285   :  { %v595_v25 = vpop.permute.xlu1 %594  ;;  %2611 = vmatpush3.msra.mxu1 %v597_v62 }
 0x286   :  { %2612 = vmatprep.subr.mxu1 %v595_v25 }
 0x287   :  { %2613 = vmatpush3.msra.mxu1 %v595_v25 }
 0x288   :  { %2614 = vmatprep.subr.mxu1 %v593_v3 }
 0x289   :  { %v591_v4 = vpop.permute.xlu1 %590  ;;  %2615 = vmatpush3.msra.mxu1 %v593_v3 }
 0x28a   :  { %2616 = vmatprep.subr.mxu1 %v591_v4 }
 0x28b   :  { %2617 = vmatpush3.msra.mxu1 %v591_v4  ;;  %v767_v40 = vpop.permute.xlu0 %766 }
 0x28c   :  { %2619 = vmatmul.mubr.msk.f32.vlgmr.msra.gmra.mxu1 %vm614_vm1, %v527_v5  ;;  %2630 = vmatprep.subr.mxu1 %v767_v40 }
 0x28d   :  { %v765_v45 = vpop.permute.xlu1 %764  ;;  %2631 = vmatpush3.msra.mxu1 %v767_v40  ;;  %2621 = vmatprep.mubr.msk.f32.mxu1 %vm614_vm1, %v528_v32 }
 0x28e   :  { %2632 = vmatprep.subr.mxu1 %v765_v45 }
 0x28f   :  { %2633 = vmatpush3.msra.mxu1 %v765_v45  ;;  %v763_v19 = vpop.permute.xlu0 %762 }
 0x290   :  { %2622 = vmatmul.mubr.msk.f32.gmra.mxu1 %vm614_vm1, %v529_v9  ;;  %2634 = vmatprep.subr.mxu1 %v763_v19 }
 0x291   :  { %v761_v16 = vpop.permute.xlu1 %760  ;;  %2635 = vmatpush3.msra.mxu1 %v763_v19  ;;  %2624 = vmatprep.mubr.msk.f32.mxu1 %vm614_vm1, %v530_v14 }
 0x292   :  { %2636 = vmatprep.subr.mxu1 %v761_v16 }
 0x293   :  { %2637 = vmatpush3.msra.mxu1 %v761_v16  ;;  %v759_v33 = vpop.permute.xlu0 %758 }
 0x294   :  { %2625 = vmatmul.mubr.msk.f32.gmra.mxu1 %vm614_vm1, %v531_v26  ;;  %2638 = vmatprep.subr.mxu1 %v759_v33 }
 0x295   :  { %v757_v20 = vpop.permute.xlu1 %756  ;;  %2639 = vmatpush3.msra.mxu1 %v759_v33  ;;  %2627 = vmatprep.mubr.msk.f32.mxu1 %vm614_vm1, %v532_v27 }
 0x296   :  { %2640 = vmatprep.subr.mxu1 %v757_v20 }
 0x297   :  { %2641 = vmatpush3.msra.mxu1 %v757_v20  ;;  %v755_v11 = vpop.permute.xlu0 %754 }
 0x298   :  { %2628 = vmatmul.mubr.msk.f32.gmra.mxu1 %vm614_vm1, %v533_v48  ;;  %2642 = vmatprep.subr.mxu1 %v755_v11 }
 0x299   :  { %v753_v23 = vpop.permute.xlu1 %752  ;;  %2643 = vmatpush3.msra.mxu1 %v755_v11  ;;  %2646 = vmatprep.mubr.msk.f32.mxu1 %vm614_vm1, %v3334_v13 }
 0x29a   :  { %2644 = vmatprep.subr.mxu1 %v753_v23 }
 0x29b   :  { %2645 = vmatpush3.msra.mxu1 %v753_v23 }
 0x29c   :  { %2647 = vmatmul.mubr.msk.f32.vlgmr.msra.gmra.mxu1 %vm614_vm1, %v527_v5  ;;  %2686 = vmatprep.subr.mxu1 %v2913_v51 }
 0x29d   :  { %2687 = vmatpush3.msra.mxu1 %v3256_v1  ;;  %2649 = vmatprep.mubr.msk.f32.mxu1 %vm614_vm1, %v528_v32 }
 0x29e   :  { %2688 = vmatprep.subr.mxu1 %v2913_v51 }
 0x29f   :  { %2689 = vmatpush3.msra.mxu1 %v3246_v31 }
 0x2a0   :  { %2650 = vmatmul.mubr.msk.f32.gmra.mxu1 %vm614_vm1, %v529_v9  ;;  %2690 = vmatprep.subr.mxu1 %v2913_v51 }
 0x2a1   :  { %2691 = vmatpush3.msra.mxu1 %v3242_v30  ;;  %2652 = vmatprep.mubr.msk.f32.mxu1 %vm614_vm1, %v530_v14 }
 0x2a2   :  { %2692 = vmatprep.subr.mxu1 %v2913_v51 }
 0x2a3   :  { %2693 = vmatpush3.msra.mxu1 %v3232_v15 }
 0x2a4   :  { %2653 = vmatmul.mubr.msk.f32.gmra.mxu1 %vm614_vm1, %v531_v26  ;;  %2694 = vmatprep.subr.mxu1 %v2913_v51 }
 0x2a5   :  { %2695 = vmatpush3.msra.mxu1 %v3228_v54  ;;  %2655 = vmatprep.mubr.msk.f32.mxu1 %vm614_vm1, %v532_v27  ;;  %v3474_v54 = vld [vmem:[%s4160_s3] sm:$0xff] }
 0x2a6   :  { %2696 = vmatprep.subr.mxu1 %v2913_v51  ;;  %v550_v15 = vpop.permute.xlu1 %549 }
 0x2a7   :  { %2697 = vmatpush3.msra.mxu1 %v3218_v2  ;;  %v545_v2 = vpop.permute.xlu0 %544 }
 0x2a8   :  { %2656 = vmatmul.mubr.msk.f32.gmra.mxu1 %vm614_vm1, %v533_v48  ;;  %2698 = vmatprep.subr.mxu1 %v2913_v51 }
 0x2a9   :  { %2699 = vmatpush3.msra.mxu1 %v3214_v44  ;;  %2702 = vmatprep.mubr.msk.f32.mxu1 %vm2914_vm2, %v2913_v51  ;;  %v3483_v44 = vld [vmem:[%s4161_s4] sm:$0xff] }
 0x2aa   :  { %2700 = vmatprep.subr.mxu1 %v2913_v51  ;;  %v555_v13 = vpop.permute.xlu1 %554 }
 0x2ab   :  { %2701 = vmatpush3.msra.mxu1 %v3205_v50  ;;  %v560_v30 = vpop.permute.xlu0 %559 }
 0x2ac   :  { %2703 = vmatmul.mubr.msk.f32.vlgmr.msra.gmra.mxu1 %vm614_vm1, %v3474_v54 }
 0x2ad   :  { %2707 = vmatprep.mubr.msk.f32.mxu1 %vm1214_vm3, %v3483_v44 }
 0x2ae   :  { %v565_v47 = vpop.permute.xlu1 %564 }
 0x2af   :  { %v570_v57 = vpop.permute.xlu0 %569 }
 0x2b2   :  { %v575_v16 = vpop.permute.xlu1 %574 }
 0x2b3   :  { %v580_v45 = vpop.permute.xlu0 %579 }
 0x34c   :  { %v2620_v31 = vpop.f32.mrf.mxu1 }
 0x34d   :  { %v711_v1 = vadd.f32 %v2620_v31, %v550_v15 }
 0x34e   :  { %v705_v52 = vpop.f32.mrf.mxu1 }
 0x34f   :  { %v706_v50 = vadd.f32 %v705_v52, %v545_v2  ;;  %v882_v28 = vmul.f32 %v711_v1, %v3342_v22 }
 0x350   :  { %v2623_v29 = vpop.f32.mrf.mxu1 }
 0x351   :  { %v881_v17 = vmul.f32 %v706_v50, %v3352_v0  ;;  %v721_v35 = vadd.f32 %v2623_v29, %v560_v30  ;;  %v898_v62 = vadd.f32 %v882_v28, %v3342_v22 }
 0x352   :  { %v715_v58 = vpop.f32.mrf.mxu1 }
 0x353   :  { %v897_v59 = vadd.f32 %v881_v17, %v3352_v0  ;;  %v716_v21 = vadd.f32 %v715_v58, %v555_v13  ;;  %v884_v63 = vmul.f32 %v721_v35, %v3327_v12 }
 0x354   :  { %v2626_v25 = vpop.f32.mrf.mxu1 }
 0x355   :  { %v883_v3 = vmul.f32 %v716_v21, %v3346_v55  ;;  %v731_v4 = vadd.f32 %v2626_v25, %v570_v57  ;;  %2662 = vmatprep.mubr.msk.f32.mxu0 %vm922_vm4, %v897_v59  ;;  %v900_v0 = vadd.f32 %v884_v63, %v3327_v12 }
 0x356   :  { %v725_v5 = vpop.f32.mrf.mxu1  ;;  %2663 = vmatmul.mubr.msk.f32.vlgmr.msra.gmra.mxu0 %vm922_vm4, %v898_v62 }
 0x357   :  { %v899_v32 = vadd.f32 %v883_v3, %v3346_v55  ;;  %v726_v40 = vadd.f32 %v725_v5, %v565_v47  ;;  %v886_v9 = vmul.f32 %v731_v4, %v3317_v6 }
 0x358   :  { %v2629_v22 = vpop.f32.mrf.mxu1 }
 0x359   :  { %v885_v14 = vmul.f32 %v726_v40, %v3338_v18  ;;  %v741_v19 = vadd.f32 %v2629_v22, %v580_v45  ;;  %2665 = vmatprep.mubr.msk.f32.mxu0 %vm922_vm4, %v899_v32  ;;  %v902_v55 = vadd.f32 %v886_v9, %v3317_v6 }
 0x35a   :  { %v735_v26 = vpop.f32.mrf.mxu1  ;;  %2666 = vmatmul.mubr.msk.f32.gmra.mxu0 %vm922_vm4, %v900_v0 }
 0x35b   :  { %v901_v27 = vadd.f32 %v885_v14, %v3338_v18  ;;  %v736_v33 = vadd.f32 %v735_v26, %v575_v16  ;;  %v888_v20 = vmul.f32 %v741_v19, %v3321_v7 }
 0x35c   :  { %v2648_v12 = vpop.f32.mrf.mxu1 }
 0x35d   :  { %v887_v48 = vmul.f32 %v736_v33, %v3323_v8  ;;  %v848_v11 = vadd.f32 %v2648_v12, %v550_v15  ;;  %2668 = vmatprep.mubr.msk.f32.mxu0 %vm922_vm4, %v901_v27  ;;  %v904_v52 = vadd.f32 %v888_v20, %v3321_v7  ;;  %v2895_v27 = vld [vmem:[%s4152_s0 + $0x10] sm:$0xff]  ;;  %v2896_v12 = vld [vmem:[%s4152_s0 + $0x18] sm:$0xff] }
 0x35e   :  { %v842_v23 = vpop.f32.mrf.mxu1  ;;  %2669 = vmatmul.mubr.msk.f32.gmra.mxu0 %vm922_vm4, %v902_v55 }
 0x35f   :  { %v903_v31 = vadd.f32 %v887_v48, %v3323_v8  ;;  %v843_v1 = vadd.f32 %v842_v23, %v545_v2  ;;  %v890_v18 = vmul.f32 %v848_v11, %v3378_v46 }
 0x360   :  { %v2651_v50 = vpop.f32.mrf.mxu1 }
 0x361   :  { %v889_v6 = vmul.f32 %v843_v1, %v3382_v24  ;;  %v858_v28 = vadd.f32 %v2651_v50, %v560_v30  ;;  %2671 = vmatprep.mubr.msk.f32.mxu0 %vm922_vm4, %v903_v31  ;;  %v906_v35 = vadd.f32 %v890_v18, %v3378_v46  ;;  %v2897_v1 = vld [vmem:[%s4152_s0 + $0x20] sm:$0xff]  ;;  %v2898_v18 = vld [vmem:[%s4152_s0 + $0x28] sm:$0xff] }
 0x362   :  { %v852_v29 = vpop.f32.mrf.mxu1  ;;  %2672 = vmatmul.mubr.msk.f32.gmra.mxu0 %vm922_vm4, %v904_v52 }
 0x363   :  { %v905_v15 = vadd.f32 %v889_v6, %v3382_v24  ;;  %v853_v17 = vadd.f32 %v852_v29, %v555_v13  ;;  %v892_v8 = vmul.f32 %v858_v28, %v3370_v42 }
 0x364   :  { %v2654_v2 = vpop.f32.mrf.mxu1 }
 0x365   :  { %v891_v7 = vmul.f32 %v853_v17, %v3374_v43  ;;  %v868_v58 = vadd.f32 %v2654_v2, %v570_v57  ;;  %2674 = vmatprep.mubr.msk.f32.mxu0 %vm922_vm4, %v905_v15  ;;  %v908_v62 = vadd.f32 %v892_v8, %v3370_v42  ;;  %v3531_v42 = vld [vmem:[%s4161_s4 + $0x8] sm:$0xff]  ;;  %v2899_v8 = vld [vmem:[%s4152_s0 + $0x30] sm:$0xff] }
 0x366   :  { %v862_v59 = vpop.f32.mrf.mxu1  ;;  %2675 = vmatmul.mubr.msk.f32.gmra.mxu0 %vm922_vm4, %v906_v35 }
 0x367   :  { %v907_v30 = vadd.f32 %v891_v7, %v3374_v43  ;;  %v863_v21 = vadd.f32 %v862_v59, %v565_v47  ;;  %v894_v24 = vmul.f32 %v868_v58, %v3362_v39  ;;  %v2900_v59 = vld [vmem:[%s4152_s0 + $0x38] sm:$0xff] }
 0x368   :  { %v2657_v13 = vpop.f32.mrf.mxu1 }
 0x369   :  { %v893_v46 = vmul.f32 %v863_v21, %v3366_v41  ;;  %v878_v63 = vadd.f32 %v2657_v13, %v580_v45  ;;  %2677 = vmatprep.mubr.msk.f32.mxu0 %vm922_vm4, %v907_v30  ;;  %v910_v4 = vadd.f32 %v894_v24, %v3362_v39  ;;  %v2894_v45 = vld [vmem:[%s4152_s0] sm:$0xff] }
 0x36a   :  { %v872_v25 = vpop.f32.mrf.mxu1  ;;  %2678 = vmatmul.mubr.msk.f32.gmra.mxu0 %vm922_vm4, %v908_v62 }
 0x36b   :  { %v909_v57 = vadd.f32 %v893_v46, %v3366_v41  ;;  %v873_v3 = vadd.f32 %v872_v25, %v575_v16  ;;  %v896_v43 = vmul.f32 %v878_v63, %v3354_v34  ;;  %v2901_v46 = vld [vmem:[%s4152_s0 + $0x40] sm:$0xff] }
 0x36c   :  { %v1210_v47 = vpop.f32.mrf.mxu1 }
 0x36d   :  { %v895_v5 = vmul.f32 %v873_v3, %v3358_v38  ;;  %2680 = vmatprep.mubr.msk.f32.mxu0 %vm922_vm4, %v909_v57  ;;  %2705 = vmatprep.subr.mxu1 %v1210_v47  ;;  %v912_v39 = vadd.f32 %v896_v43, %v3354_v34  ;;  %v2902_v3 = vld [vmem:[%s4152_s0 + $0x48] sm:$0xff] }
 0x36e   :  { %2681 = vmatmul.mubr.msk.f32.gmra.mxu0 %vm922_vm4, %v910_v4  ;;  %2706 = vmatpush3.msra.mxu1 %v1210_v47  ;;  %v2704_v41 = vpop.f32.mrf.mxu1 }
 0x36f   :  { %v911_v32 = vadd.f32 %v895_v5, %v3358_v38  ;;  %2719 = vmatprep.subr.mxu1 %v2913_v51  ;;  %2708 = vmatmul.mubr.msk.f32.vlgmr.msra.gmra.mxu1 %vm1214_vm3, %v3531_v42 }
 0x370   :  { %2720 = vmatpush3.msra.mxu1 %v3310_v37 }
 0x371   :  { %2683 = vmatprep.mubr.msk.f32.mxu0 %vm922_vm4, %v911_v32  ;;  %2721 = vmatprep.subr.mxu1 %v2913_v51  ;;  %v2903_v32 = vld [vmem:[%s4152_s0 + $0x50] sm:$0xff] }
 0x372   :  { %2684 = vmatmul.mubr.msk.f32.gmra.mxu0 %vm922_vm4, %v912_v39  ;;  %2722 = vmatpush3.msra.mxu1 %v3302_v61  ;;  %v3607_v61 = vld [vmem:[%s4162_s10] ss:$0 sm:$0xff] }
 0x373   :  { %2723 = vmatprep.subr.mxu1 %v2913_v51  ;;  %2740 = vmatprep.mubr.msk.f32.mxu0 %vm1214_vm3, %v3483_v44  ;;  %v2893_v44 = vld [vmem:[%s4152_s0 + $0x8] sm:$0xff] }
 0x374   :  { %2724 = vmatpush3.msra.mxu1 %v3298_v60  ;;  %v3595_v60 = vld [vmem:[%s4161_s4 + $0x38] sm:$0xff] }
 0x375   :  { %2725 = vmatprep.subr.mxu1 %v2913_v51 }
 0x376   :  { %2726 = vmatpush3.msra.mxu1 %v3288_v56  ;;  %v3563_v56 = vld [vmem:[%s4161_s4 + $0x10] sm:$0xff] }
 0x377   :  { %2727 = vmatprep.subr.mxu1 %v2913_v51  ;;  %2710 = vmatprep.mubr.msk.f32.mxu1 %vm1214_vm3, %v3563_v56 }
 0x378   :  { %2728 = vmatpush3.msra.mxu1 %v3284_v53  ;;  %v3568_v53 = vld [vmem:[%s4161_s4 + $0x18] sm:$0xff] }
 0x379   :  { %2729 = vmatprep.subr.mxu1 %v2913_v51  ;;  %2711 = vmatmul.mubr.msk.f32.gmra.mxu1 %vm1214_vm3, %v3568_v53 }
 0x37a   :  { %2730 = vmatpush3.msra.mxu1 %v3274_v36  ;;  %v3573_v36 = vld [vmem:[%s4161_s4 + $0x20] sm:$0xff] }
 0x37b   :  { %2731 = vmatprep.subr.mxu1 %v2913_v51  ;;  %2713 = vmatprep.mubr.msk.f32.mxu1 %vm1214_vm3, %v3573_v36 }
 0x37c   :  { %2732 = vmatpush3.msra.mxu1 %v3270_v49  ;;  %v1139_v49 = vld [vmem:[%s4161_s4 + $0x30] sm:$0xff] }
 0x37d   :  { %2733 = vmatprep.subr.mxu1 %v2913_v51 }
 0x37e   :  { %2734 = vmatpush3.msra.mxu1 %v3260_v10  ;;  %v3584_v10 = vld [vmem:[%s4161_s4 + $0x28] sm:$0xff] }
 0x37f   :  { %2714 = vmatmul.mubr.msk.f32.gmra.mxu1 %vm1214_vm3, %v3584_v10 }
 0x380   :  { %2716 = vmatprep.mubr.msk.f32.mxu1 %vm1214_vm3, %v1139_v49 }
 0x383   :  { %2717 = vmatmul.mubr.msk.f32.gmra.mxu1 %vm1214_vm3, %v3595_v60 }
 0x384   :  { %2735 = vmatprep.mubr.msk.f32.mxu1 %vm2914_vm2, %v2913_v51 }
 0x387   :  { %2736 = vmatmul.mubr.msk.f32.vlgmr.msra.gmra.mxu1 %vm614_vm1, %v3474_v54 }
 0x388   :  { %2749 = vmatprep.mubr.msk.f32.mxu1 %vm1214_vm3, %v1139_v49  ;;  %v2904_v49 = vld [vmem:[%s4152_s0 + $0x58] sm:$0xff] }
 0x416   :  { %v2664_v37 = vpop.f32.mrf.mxu0 }
 0x417   :  { %v1043_v34 = vadd.f32 %v2664_v37, %v3607_v61 }
 0x418   :  { %v1037_v38 = vpop.f32.mrf.mxu0 }
 0x419   :  { %v3613_v40 = vadd.f32 %v2893_v44, %v1043_v34  ;;  %v1038_v51 = vadd.f32 %v3607_v61, %v1037_v38 }
 0x41a   :  { %v2667_v54 = vpop.f32.mrf.mxu0 }
 0x41b   :  { %v3619_v0 = vadd.f32 %v2894_v45, %v1038_v51  ;;  %v1522_v9 = vsel %vm68_vm0, %v3613_v40, 0.0  ;;  %v1053_v14 = vadd.f32 %v2667_v54, %v3607_v61 }
 0x41c   :  { %1523 = vadd.xlane.f32.xlu0 %v1522_v9  ;;  %v1047_v22 = vpop.f32.mrf.mxu0  ;;  %v2905_v9 = vld [vmem:[%s4152_s0 + $0x60] sm:$0xff] }
 0x41d   :  { %v1048_v19 = vadd.f32 %v3607_v61, %v1047_v22  ;;  %v1519_v16 = vsel %vm68_vm0, %v3619_v0, 0.0  ;;  %v3636_v48 = vadd.f32 %v2896_v12, %v1053_v14  ;;  %v2907_v12 = vld [vmem:[%s4152_s0 + $0x70] sm:$0xff] }
 0x41e   :  { %1520 = vadd.xlane.f32.xlu1 %v1519_v16  ;;  %v2670_v26 = vpop.f32.mrf.mxu0  ;;  %v2906_v16 = vld [vmem:[%s4152_s0 + $0x68] sm:$0xff] }
 0x41f   :  { %v3630_v33 = vadd.f32 %v2895_v27, %v1048_v19  ;;  %v1063_v55 = vadd.f32 %v2670_v26, %v3607_v61  ;;  %v1528_v15 = vsel %vm68_vm0, %v3636_v48, 0.0 }
 0x420   :  { %v1057_v20 = vpop.f32.mrf.mxu0 }
 0x421   :  { %v1058_v11 = vadd.f32 %v3607_v61, %v1057_v20  ;;  %v1525_v23 = vsel %vm68_vm0, %v3630_v33, 0.0  ;;  %v3649_v50 = vadd.f32 %v2898_v18, %v1063_v55 }
 0x422   :  { %1526 = vadd.xlane.f32.xlu0 %v1525_v23  ;;  %v2673_v31 = vpop.f32.mrf.mxu0  ;;  %v2908_v23 = vld [vmem:[%s4152_s0 + $0x78] sm:$0xff] }
 0x423   :  { %v3644_v52 = vadd.f32 %v2897_v1, %v1058_v11  ;;  %v1073_v28 = vadd.f32 %v2673_v31, %v3607_v61  ;;  %v1534_v58 = vsel %vm68_vm0, %v3649_v50, 0.0 }
 0x424   :  { %v1067_v6 = vpop.f32.mrf.mxu0 }
 0x425   :  { %v1068_v29 = vadd.f32 %v3607_v61, %v1067_v6  ;;  %v1531_v17 = vsel %vm68_vm0, %v3644_v52, 0.0  ;;  %v3667_v30 = vadd.f32 %v2900_v59, %v1073_v28 }
 0x426   :  { %1529 = vadd.xlane.f32.xlu0 %v1528_v15  ;;  %1532 = vadd.xlane.f32.xlu1 %v1531_v17  ;;  %v2676_v35 = vpop.f32.mrf.mxu0 }
 0x427   :  { %v3660_v2 = vadd.f32 %v2899_v8, %v1068_v29  ;;  %v1083_v21 = vadd.f32 %v2676_v35, %v3607_v61  ;;  %v1540_v47 = vsel %vm68_vm0, %v3667_v30, 0.0 }
 0x428   :  { %v1077_v7 = vpop.f32.mrf.mxu0 }
 0x429   :  { %v1078_v62 = vadd.f32 %v3607_v61, %v1077_v7  ;;  %v1537_v24 = vsel %vm68_vm0, %v3660_v2, 0.0  ;;  %v3682_v4 = vadd.f32 %v2902_v3, %v1083_v21 }
 0x42a   :  { %1535 = vadd.xlane.f32.xlu0 %v1534_v58  ;;  %v2679_v13 = vpop.f32.mrf.mxu0  ;;  %1538 = vadd.xlane.f32.xlu1 %v1537_v24 }
 0x42b   :  { %v3676_v63 = vadd.f32 %v2901_v46, %v1078_v62  ;;  %v1093_v25 = vadd.f32 %v2679_v13, %v3607_v61  ;;  %v1546_v51 = vsel %vm68_vm0, %v3682_v4, 0.0 }
 0x42c   :  { %v1087_v57 = vpop.f32.mrf.mxu0 }
 0x42d   :  { %v1088_v43 = vadd.f32 %v3607_v61, %v1087_v57  ;;  %v1543_v5 = vsel %vm68_vm0, %v3676_v63, 0.0  ;;  %v3697_v37 = vadd.f32 %v2904_v49, %v1093_v25 }
 0x42e   :  { %1541 = vadd.xlane.f32.xlu0 %v1540_v47  ;;  %v2682_v41 = vpop.f32.mrf.mxu0  ;;  %1544 = vadd.xlane.f32.xlu1 %v1543_v5 }
 0x42f   :  { %v3692_v39 = vadd.f32 %v2903_v32, %v1088_v43  ;;  %v1103_v38 = vadd.f32 %v2682_v41, %v3607_v61  ;;  %v1552_v19 = vsel %vm68_vm0, %v3697_v37, 0.0 }
 0x430   :  { %v1097_v34 = vpop.f32.mrf.mxu0 }
 0x431   :  { %v1098_v44 = vadd.f32 %v3607_v61, %v1097_v34  ;;  %v1549_v54 = vsel %vm68_vm0, %v3692_v39, 0.0  ;;  %v3715_v26 = vadd.f32 %v2906_v16, %v1103_v38 }
 0x432   :  { %1547 = vadd.xlane.f32.xlu0 %v1546_v51  ;;  %v2685_v45 = vpop.f32.mrf.mxu0  ;;  %1550 = vadd.xlane.f32.xlu1 %v1549_v54  ;;  %v3765_v51 = vpop.f32.mrf.mxu1 }
 0x433   :  { %v3708_v22 = vadd.f32 %v2905_v9, %v1098_v44  ;;  %v1113_v27 = vadd.f32 %v2685_v45, %v3607_v61 }
 0x434   :  { %v1107_v14 = vpop.f32.mrf.mxu0 }
 0x435   :  { %v1108_v55 = vadd.f32 %v3607_v61, %v1107_v14  ;;  %v1555_v20 = vsel %vm68_vm0, %v3708_v22, 0.0  ;;  %v3729_v31 = vadd.f32 %v2908_v23, %v1113_v27  ;;  %v1558_v61 = vsel %vm68_vm0, %v3715_v26, 0.0  ;;  %v3779_v23 = vpop.f32.mrf.mxu1 }
 0x436   :  { %1553 = vadd.xlane.f32.xlu0 %v1552_v19  ;;  %1556 = vadd.xlane.f32.xlu1 %v1555_v20 }
 0x437   :  { %v3724_v11 = vadd.f32 %v2907_v12, %v1108_v55  ;;  %v1564_v18 = vsel %vm68_vm0, %v3729_v31, 0.0 }
 0x439   :  { %v1561_v1 = vsel %vm68_vm0, %v3724_v11, 0.0 }
 0x43a   :  { %1559 = vadd.xlane.f32.xlu0 %v1558_v61  ;;  %1562 = vadd.xlane.f32.xlu1 %v1561_v1 }
 0x43e   :  { %1565 = vadd.xlane.f32.xlu0 %v1564_v18 }
 0x4a5   :  { %v1524_v6 = vpop.xlane.xlu0 %1523 }
 0x4a6   :  { %v1568_v28 = vmul.f32 0.03125, %v1524_v6 }
 0x4a7   :  { %v1521_v29 = vpop.xlane.xlu1 %1520 }
 0x4a8   :  { %v3738_v15 = vsub.f32 %v3613_v40, %v1568_v28  ;;  %v1567_v17 = vmul.f32 0.03125, %v1521_v29 }
 0x4aa   :  { %v3741_v35 = vsub.f32 %v3619_v0, %v1567_v17  ;;  %v1600_v8 = vmul.f32 %v3738_v15, %v3738_v15 }
 0x4ab   :  { %v1527_v7 = vpop.xlane.xlu0 %1526 }
 0x4ac   :  { %v1569_v58 = vmul.f32 0.03125, %v1527_v7  ;;  %v1618_v59 = vsel %vm68_vm0, %v1600_v8, 0.0  ;;  %v1599_v21 = vmul.f32 %v3741_v35, %v3741_v35 }
 0x4ad   :  { %1619 = vadd.xlane.f32.xlu0 %v1618_v59  ;;  %v3793_v59 = vpop.f32.mrf.mxu1 }
 0x4ae   :  { %v3749_v62 = vsub.f32 %v3630_v33, %v1569_v58  ;;  %v1615_v24 = vsel %vm68_vm0, %v1599_v21, 0.0 }
 0x4af   :  { %v1533_v13 = vpop.xlane.xlu1 %1532  ;;  %1616 = vadd.xlane.f32.xlu1 %v1615_v24  ;;  %v1530_v46 = vpop.xlane.xlu0 %1529 }
 0x4b0   :  { %v1571_v25 = vmul.f32 0.03125, %v1533_v13  ;;  %v1570_v57 = vmul.f32 0.03125, %v1530_v46  ;;  %v1601_v3 = vmul.f32 %v3749_v62, %v3749_v62 }
 0x4b2   :  { %v3755_v43 = vsub.f32 %v3644_v52, %v1571_v25  ;;  %v3758_v47 = vsub.f32 %v3636_v48, %v1570_v57  ;;  %v1621_v5 = vsel %vm68_vm0, %v1601_v3, 0.0  ;;  %v3803_v25 = vpop.f32.mrf.mxu1 }
 0x4b3   :  { %v1539_v41 = vpop.xlane.xlu1 %1538  ;;  %1622 = vadd.xlane.f32.xlu1 %v1621_v5  ;;  %v1536_v32 = vpop.xlane.xlu0 %1535 }
 0x4b4   :  { %v1573_v49 = vmul.f32 0.03125, %v1539_v41  ;;  %v1572_v34 = vmul.f32 0.03125, %v1536_v32  ;;  %v1603_v38 = vmul.f32 %v3755_v43, %v3755_v43  ;;  %v1602_v44 = vmul.f32 %v3758_v47, %v3758_v47 }
 0x4b6   :  { %v3768_v54 = vsub.f32 %v3660_v2, %v1573_v49  ;;  %v3771_v45 = vsub.f32 %v3649_v50, %v1572_v34  ;;  %v1627_v9 = vsel %vm68_vm0, %v1603_v38, 0.0  ;;  %v1624_v14 = vsel %vm68_vm0, %v1602_v44, 0.0  ;;  %v3809_v34 = vpop.f32.mrf.mxu1 }
 0x4b7   :  { %v1545_v19 = vpop.xlane.xlu1 %1544  ;;  %1628 = vadd.xlane.f32.xlu1 %v1627_v9  ;;  %1625 = vadd.xlane.f32.xlu0 %v1624_v14  ;;  %v1542_v16 = vpop.xlane.xlu0 %1541 }
 0x4b8   :  { %v1575_v27 = vmul.f32 0.03125, %v1545_v19  ;;  %v1574_v55 = vmul.f32 0.03125, %v1542_v16  ;;  %v1605_v20 = vmul.f32 %v3768_v54, %v3768_v54  ;;  %v1604_v12 = vmul.f32 %v3771_v45, %v3771_v45  ;;  %v3819_v19 = vpop.f32.mrf.mxu1 }
 0x4ba   :  { %v3782_v61 = vsub.f32 %v3676_v63, %v1575_v27  ;;  %v3785_v1 = vsub.f32 %v3667_v30, %v1574_v55  ;;  %v1633_v18 = vsel %vm68_vm0, %v1605_v20, 0.0  ;;  %v1630_v6 = vsel %vm68_vm0, %v1604_v12, 0.0 }
 0x4bb   :  { %v1551_v28 = vpop.xlane.xlu1 %1550  ;;  %1634 = vadd.xlane.f32.xlu1 %v1633_v18  ;;  %1631 = vadd.xlane.f32.xlu0 %v1630_v6  ;;  %v1548_v29 = vpop.xlane.xlu0 %1547 }
 0x4bc   :  { %v1577_v17 = vmul.f32 0.03125, %v1551_v28  ;;  %v1576_v8 = vmul.f32 0.03125, %v1548_v29  ;;  %v1607_v7 = vmul.f32 %v3782_v61, %v3782_v61  ;;  %v1606_v58 = vmul.f32 %v3785_v1, %v3785_v1  ;;  %v3825_v6 = vpop.f32.mrf.mxu1 }
 0x4be   :  { %v3796_v21 = vsub.f32 %v3692_v39, %v1577_v17  ;;  %v3799_v24 = vsub.f32 %v3682_v4, %v1576_v8  ;;  %v1639_v13 = vsel %vm68_vm0, %v1607_v7, 0.0  ;;  %v1636_v46 = vsel %vm68_vm0, %v1606_v58, 0.0  ;;  %v3835_v7 = vpop.f32.mrf.mxu1 }
 0x4bf   :  { %v1557_v57 = vpop.xlane.xlu1 %1556  ;;  %1640 = vadd.xlane.f32.xlu1 %v1639_v13  ;;  %1637 = vadd.xlane.f32.xlu0 %v1636_v46  ;;  %v1554_v3 = vpop.xlane.xlu0 %1553 }
 0x4c0   :  { %v1579_v5 = vmul.f32 0.03125, %v1557_v57  ;;  %v1578_v41 = vmul.f32 0.03125, %v1554_v3  ;;  %v1609_v32 = vmul.f32 %v3796_v21, %v3796_v21  ;;  %v1608_v49 = vmul.f32 %v3799_v24, %v3799_v24  ;;  %v1410_v3 = vpop.f32.mrf.mxu1 }
 0x4c1   :  { %2738 = vmatprep.subr.mxu0 %v1410_v3  ;;  %2820 = vmatprep.subr.mxu1 %v1410_v3 }
 0x4c2   :  { %v3812_v38 = vsub.f32 %v3708_v22, %v1579_v5  ;;  %v3815_v44 = vsub.f32 %v3697_v37, %v1578_v41  ;;  %v1645_v9 = vsel %vm68_vm0, %v1609_v32, 0.0  ;;  %v1642_v14 = vsel %vm68_vm0, %v1608_v49, 0.0  ;;  %v2737_v49 = vpop.f32.mrf.mxu1  ;;  %2739 = vmatpush3.msra.mxu0 %v1410_v3  ;;  %2821 = vmatpush3.msra.mxu1 %v1410_v3 }
 0x4c3   :  { %v1563_v16 = vpop.xlane.xlu1 %1562  ;;  %1646 = vadd.xlane.f32.xlu1 %v1645_v9  ;;  %1643 = vadd.xlane.f32.xlu0 %v1642_v14  ;;  %v1560_v27 = vpop.xlane.xlu0 %1559  ;;  %v1762_v9 = vld [vmem:[%s4163_s11 + $0x18] sm:$0xff] }
 0x4c4   :  { %v1581_v55 = vmul.f32 0.03125, %v1563_v16  ;;  %v1580_v20 = vmul.f32 0.03125, %v1560_v27  ;;  %v1611_v12 = vmul.f32 %v3812_v38, %v3812_v38  ;;  %v1610_v18 = vmul.f32 %v3815_v44, %v3815_v44  ;;  %2750 = vmatmul.mubr.msk.f32.vlgmr.msra.gmra.mxu1 %vm1214_vm3, %v3595_v60  ;;  %2752 = vmatprep.subr.mxu1 %v1762_v9  ;;  %v1761_v16 = vld [vmem:[%s4163_s11 + $0x10] sm:$0xff]  ;;  %v1759_v60 = vld [vmem:[%s4163_s11] sm:$0xff] }
 0x4c5   :  { %2753 = vmatpush3.msra.mxu1 %v1762_v9  ;;  %2741 = vmatmul.mubr.msk.f32.vlgmr.msra.gmra.mxu0 %vm1214_vm3, %v3531_v42 }
 0x4c6   :  { %v3828_v28 = vsub.f32 %v3724_v11, %v1581_v55  ;;  %v3831_v29 = vsub.f32 %v3715_v26, %v1580_v20  ;;  %v1651_v17 = vsel %vm68_vm0, %v1611_v12, 0.0  ;;  %v1648_v8 = vsel %vm68_vm0, %v1610_v18, 0.0  ;;  %2754 = vmatprep.subr.mxu1 %v1761_v16  ;;  %v1760_v55 = vld [vmem:[%s4163_s11 + $0x8] sm:$0xff]  ;;  %2743 = vmatprep.mubr.msk.f32.mxu0 %vm1214_vm3, %v3563_v56 }
 0x4c7   :  { %1652 = vadd.xlane.f32.xlu1 %v1651_v17  ;;  %1649 = vadd.xlane.f32.xlu0 %v1648_v8  ;;  %v1566_v58 = vpop.xlane.xlu0 %1565 }
 0x4c8   :  { %v1582_v13 = vmul.f32 0.03125, %v1566_v58  ;;  %v1613_v46 = vmul.f32 %v3828_v28, %v3828_v28  ;;  %v1612_v57 = vmul.f32 %v3831_v29, %v3831_v29  ;;  %2755 = vmatpush3.msra.mxu1 %v1761_v16 }
 0x4c9   :  { %2756 = vmatprep.subr.mxu1 %v1760_v55  ;;  %2744 = vmatmul.mubr.msk.f32.gmra.mxu0 %vm1214_vm3, %v3568_v53 }
 0x4ca   :  { %v3842_v5 = vsub.f32 %v3729_v31, %v1582_v13  ;;  %v1657_v41 = vsel %vm68_vm0, %v1613_v46, 0.0  ;;  %v1654_v32 = vsel %vm68_vm0, %v1612_v57, 0.0  ;;  %2757 = vmatpush3.msra.mxu1 %v1760_v55  ;;  %2746 = vmatprep.mubr.msk.f32.mxu0 %vm1214_vm3, %v3573_v36 }
 0x4cb   :  { %1658 = vadd.xlane.f32.xlu1 %v1657_v41  ;;  %1655 = vadd.xlane.f32.xlu0 %v1654_v32 }
 0x4cc   :  { %v1614_v14 = vmul.f32 %v3842_v5, %v3842_v5  ;;  %2758 = vmatprep.subr.mxu1 %v1759_v60 }
 0x4cd   :  { %2759 = vmatpush3.msra.mxu1 %v1759_v60  ;;  %2747 = vmatmul.mubr.msk.f32.gmra.mxu0 %vm1214_vm3, %v3584_v10 }
 0x4ce   :  { %v1660_v27 = vsel %vm68_vm0, %v1614_v14, 0.0 }
 0x4cf   :  { %1661 = vadd.xlane.f32.xlu0 %v1660_v27 }
 0x536   :  { %v1620_v42 = vpop.xlane.xlu0 %1619 }
 0x537   :  { %v1664_v56 = vmul.f32 0.03125, %v1620_v42 }
 0x538   :  { %v1617_v20 = vpop.xlane.xlu1 %1616 }
 0x539   :  { %v1680_v12 = vadd.f32 1e-06, %v1664_v56  ;;  %v1663_v18 = vmul.f32 0.03125, %v1617_v20 }
 0x53b   :  { %2861 = vrsqrt.f32 %v1680_v12  ;;  %v1679_v17 = vadd.f32 1e-06, %v1663_v18 }
 0x53c   :  { %v1623_v8 = vpop.xlane.xlu1 %1622 }
 0x53d   :  { %2863 = vrsqrt.f32 %v1679_v17  ;;  %v1665_v58 = vmul.f32 0.03125, %v1623_v8 }
 0x53f   :  { %v1681_v13 = vadd.f32 1e-06, %v1665_v58 }
 0x540   :  { %v1629_v53 = vpop.xlane.xlu1 %1628  ;;  %v1626_v46 = vpop.xlane.xlu0 %1625 }
 0x541   :  { %2865 = vrsqrt.f32 %v1681_v13  ;;  %v1667_v57 = vmul.f32 0.03125, %v1629_v53  ;;  %v1666_v36 = vmul.f32 0.03125, %v1626_v46  ;;  %v3878_v53 = vld [vmem:[%s4154_s1] ss:$0 sm:$0xff] }
 0x543   :  { %v1683_v3 = vadd.f32 1e-06, %v1667_v57  ;;  %v1682_v41 = vadd.f32 1e-06, %v1666_v36 }
 0x544   :  { %v1635_v32 = vpop.xlane.xlu1 %1634  ;;  %v1632_v10 = vpop.xlane.xlu0 %1631 }
 0x545   :  { %2867 = vrsqrt.f32 %v1683_v3  ;;  %v1669_v49 = vmul.f32 0.03125, %v1635_v32  ;;  %v1668_v9 = vmul.f32 0.03125, %v1632_v10 }
 0x546   :  { %2869 = vrsqrt.f32 %v1682_v41 }
 0x547   :  { %v1685_v14 = vadd.f32 1e-06, %v1669_v49  ;;  %v1684_v16 = vadd.f32 1e-06, %v1668_v9 }
 0x548   :  { %v2862_v27 = vpop.eup %2861  ;;  %v1641_v55 = vpop.xlane.xlu1 %1640 }
 0x549   :  { %v1638_v60 = vpop.xlane.xlu0 %1637  ;;  %v1712_v42 = vmul.f32 %v2862_v27, %v3738_v15  ;;  %2871 = vrsqrt.f32 %v1685_v14  ;;  %v1671_v56 = vmul.f32 0.03125, %v1641_v55 }
 0x54a   :  { %v1670_v20 = vmul.f32 0.03125, %v1638_v60  ;;  %v2864_v12 = vpop.eup %2863  ;;  %2873 = vrsqrt.f32 %v1684_v16 }
 0x54b   :  { %v1687_v18 = vadd.f32 1e-06, %v1671_v56  ;;  %v1711_v8 = vmul.f32 %v2864_v12, %v3741_v35  ;;  %v1728_v46 = vmul.f32 %v3878_v53, %v1712_v42  ;;  %v3885_v35 = vld [vmem:[%s4155_s2] ss:$0 sm:$0xff] }
 0x54c   :  { %v1686_v17 = vadd.f32 1e-06, %v1670_v20  ;;  %v1647_v58 = vpop.xlane.xlu1 %1646 }
 0x54d   :  { %v1644_v13 = vpop.xlane.xlu0 %1643  ;;  %2875 = vrsqrt.f32 %v1687_v18  ;;  %v1673_v15 = vmul.f32 0.03125, %v1647_v58  ;;  %v1727_v36 = vmul.f32 %v3878_v53, %v1711_v8  ;;  %v1744_v16 = vadd.f32 %v3885_v35, %v1728_v46 }
 0x54e   :  { %v1672_v57 = vmul.f32 0.03125, %v1644_v13  ;;  %v2866_v3 = vpop.eup %2865  ;;  %2877 = vrsqrt.f32 %v1686_v17 }
 0x54f   :  { %v1689_v41 = vadd.f32 1e-06, %v1673_v15  ;;  %v1743_v10 = vadd.f32 %v3885_v35, %v1727_v36  ;;  %v1713_v49 = vmul.f32 %v2866_v3, %v3749_v62 }
 0x550   :  { %v1688_v32 = vadd.f32 1e-06, %v1672_v57  ;;  %v1653_v9 = vpop.xlane.xlu1 %1652 }
 0x551   :  { %v1650_v14 = vpop.xlane.xlu0 %1649  ;;  %2879 = vrsqrt.f32 %v1689_v41  ;;  %v1675_v27 = vmul.f32 0.03125, %v1653_v9  ;;  %2760 = vmatprep.mubr.msk.f32.mxu1 %vm68_vm0, %v1743_v10  ;;  %v1729_v60 = vmul.f32 %v3878_v53, %v1713_v49 }
 0x552   :  { %v1674_v55 = vmul.f32 0.03125, %v1650_v14  ;;  %v2868_v42 = vpop.eup %2867  ;;  %2881 = vrsqrt.f32 %v1688_v32  ;;  %2761 = vmatmul.mubr.msk.f32.vlgmr.msra.gmra.mxu1 %vm68_vm0, %v1744_v16 }
 0x553   :  { %v2870_v56 = vpop.eup %2869  ;;  %v1691_v20 = vadd.f32 1e-06, %v1675_v27  ;;  %v1745_v62 = vadd.f32 %v3885_v35, %v1729_v60  ;;  %v1715_v18 = vmul.f32 %v2868_v42, %v3755_v43 }
 0x554   :  { %v1690_v12 = vadd.f32 1e-06, %v1674_v55  ;;  %v1659_v17 = vpop.xlane.xlu1 %1658  ;;  %v1714_v58 = vmul.f32 %v2870_v56, %v3758_v47 }
 0x555   :  { %v1656_v8 = vpop.xlane.xlu0 %1655  ;;  %2883 = vrsqrt.f32 %v1691_v20  ;;  %v1677_v13 = vmul.f32 0.03125, %v1659_v17  ;;  %2763 = vmatprep.mubr.msk.f32.mxu1 %vm68_vm0, %v1745_v62  ;;  %v1731_v15 = vmul.f32 %v3878_v53, %v1715_v18 }
 0x556   :  { %v1676_v46 = vmul.f32 0.03125, %v1656_v8  ;;  %v2872_v57 = vpop.eup %2871  ;;  %2885 = vrsqrt.f32 %v1690_v12  ;;  %v1730_v36 = vmul.f32 %v3878_v53, %v1714_v58 }
 0x557   :  { %v2874_v3 = vpop.eup %2873  ;;  %v1693_v41 = vadd.f32 1e-06, %v1677_v13  ;;  %v1747_v43 = vadd.f32 %v3885_v35, %v1731_v15  ;;  %v1717_v10 = vmul.f32 %v2872_v57, %v3768_v54 }
 0x558   :  { %v1692_v32 = vadd.f32 1e-06, %v1676_v46  ;;  %v1746_v47 = vadd.f32 %v3885_v35, %v1730_v36  ;;  %v1716_v9 = vmul.f32 %v2874_v3, %v3771_v45 }
 0x559   :  { %v1662_v49 = vpop.xlane.xlu0 %1661  ;;  %2887 = vrsqrt.f32 %v1693_v41  ;;  %v1733_v16 = vmul.f32 %v3878_v53, %v1717_v10 }
 0x55a   :  { %v1678_v14 = vmul.f32 0.03125, %v1662_v49  ;;  %v2876_v27 = vpop.eup %2875  ;;  %2889 = vrsqrt.f32 %v1692_v32  ;;  %2764 = vmatmul.mubr.msk.f32.gmra.mxu1 %vm68_vm0, %v1746_v47  ;;  %v1732_v55 = vmul.f32 %v3878_v53, %v1716_v9 }
 0x55b   :  { %v2878_v60 = vpop.eup %2877  ;;  %2766 = vmatprep.mubr.msk.f32.mxu1 %vm68_vm0, %v1747_v43  ;;  %v1749_v54 = vadd.f32 %v3885_v35, %v1733_v16  ;;  %v1719_v56 = vmul.f32 %v2876_v27, %v3782_v61 }
 0x55c   :  { %v1694_v42 = vadd.f32 1e-06, %v1678_v14  ;;  %v1748_v45 = vadd.f32 %v3885_v35, %v1732_v55  ;;  %v1718_v20 = vmul.f32 %v2878_v60, %v3785_v1 }
 0x55d   :  { %v1735_v12 = vmul.f32 %v3878_v53, %v1719_v56 }
 0x55e   :  { %2891 = vrsqrt.f32 %v1694_v42  ;;  %v2880_v62 = vpop.eup %2879  ;;  %2767 = vmatmul.mubr.msk.f32.gmra.mxu1 %vm68_vm0, %v1748_v45  ;;  %v1734_v18 = vmul.f32 %v3878_v53, %v1718_v20  ;;  %v2064_v42 = vld [vmem:[%s4164_s13 + $0x28] sm:$0xff]  ;;  %v2059_v45 = vld [vmem:[%s4164_s13] sm:$0xff] }
 0x55f   :  { %v2882_v17 = vpop.eup %2881  ;;  %2769 = vmatprep.mubr.msk.f32.mxu1 %vm68_vm0, %v1749_v54  ;;  %v1751_v8 = vadd.f32 %v3885_v35, %v1735_v12  ;;  %v1721_v58 = vmul.f32 %v2880_v62, %v3796_v21  ;;  %2784 = vmatprep.subr.mxu0 %v2064_v42  ;;  %v2060_v54 = vld [vmem:[%s4164_s13 + $0x8] sm:$0xff]  ;;  %v2388_v12 = vld [vmem:[%s4165_s12] ss:$0 sm:$0xff] }
 0x560   :  { %v1750_v61 = vadd.f32 %v3885_v35, %v1734_v18  ;;  %v1720_v13 = vmul.f32 %v2882_v17, %v3799_v24  ;;  %2785 = vmatpush3.msra.mxu0 %v2064_v42 }
 0x561   :  { %v1737_v1 = vmul.f32 %v3878_v53, %v1721_v58 }
 0x562   :  { %v2884_v46 = vpop.eup %2883  ;;  %2770 = vmatmul.mubr.msk.f32.gmra.mxu1 %vm68_vm0, %v1750_v61  ;;  %v1736_v15 = vmul.f32 %v3878_v53, %v1720_v13 }
 0x563   :  { %v2886_v57 = vpop.eup %2885  ;;  %2772 = vmatprep.mubr.msk.f32.mxu1 %vm68_vm0, %v1751_v8  ;;  %v1753_v36 = vadd.f32 %v3885_v35, %v1737_v1  ;;  %v1723_v3 = vmul.f32 %v2884_v46, %v3812_v38 }
 0x564   :  { %v1752_v21 = vadd.f32 %v3885_v35, %v1736_v15  ;;  %v1722_v41 = vmul.f32 %v2886_v57, %v3815_v44 }
 0x565   :  { %v1739_v24 = vmul.f32 %v3878_v53, %v1723_v3 }
 0x566   :  { %v2888_v32 = vpop.eup %2887  ;;  %2773 = vmatmul.mubr.msk.f32.gmra.mxu1 %vm68_vm0, %v1752_v21  ;;  %v1738_v43 = vmul.f32 %v3878_v53, %v1722_v41 }
 0x567   :  { %v2890_v10 = vpop.eup %2889  ;;  %2775 = vmatprep.mubr.msk.f32.mxu1 %vm68_vm0, %v1753_v36  ;;  %v1755_v49 = vadd.f32 %v3885_v35, %v1739_v24  ;;  %v1725_v47 = vmul.f32 %v2888_v32, %v3828_v28 }
 0x568   :  { %v1754_v38 = vadd.f32 %v3885_v35, %v1738_v43  ;;  %v1724_v9 = vmul.f32 %v2890_v10, %v3831_v29 }
 0x569   :  { %v1741_v44 = vmul.f32 %v3878_v53, %v1725_v47 }
 0x56a   :  { %2776 = vmatmul.mubr.msk.f32.gmra.mxu1 %vm68_vm0, %v1754_v38  ;;  %v1740_v16 = vmul.f32 %v3878_v53, %v1724_v9 }
 0x56b   :  { %v2892_v14 = vpop.eup %2891  ;;  %2778 = vmatprep.mubr.msk.f32.mxu1 %vm68_vm0, %v1755_v49  ;;  %v1757_v27 = vadd.f32 %v3885_v35, %v1741_v44 }
 0x56c   :  { %v1726_v55 = vmul.f32 %v2892_v14, %v3842_v5  ;;  %v1756_v60 = vadd.f32 %v3885_v35, %v1740_v16  ;;  %v2063_v5 = vld [vmem:[%s4164_s13 + $0x20] sm:$0xff] }
 0x56d   :  { %2786 = vmatprep.subr.mxu0 %v2063_v5 }
 0x56e   :  { %v1742_v28 = vmul.f32 %v3878_v53, %v1726_v55  ;;  %2779 = vmatmul.mubr.msk.f32.gmra.mxu1 %vm68_vm0, %v1756_v60  ;;  %v2062_v53 = vld [vmem:[%s4164_s13 + $0x18] sm:$0xff]  ;;  %2787 = vmatpush3.msra.mxu0 %v2063_v5 }
 0x56f   :  { %2781 = vmatprep.mubr.msk.f32.mxu1 %vm68_vm0, %v1757_v27  ;;  %2788 = vmatprep.subr.mxu0 %v2062_v53 }
 0x570   :  { %v1758_v29 = vadd.f32 %v3885_v35, %v1742_v28  ;;  %2789 = vmatpush3.msra.mxu0 %v2062_v53  ;;  %v2061_v35 = vld [vmem:[%s4164_s13 + $0x10] sm:$0xff] }
 0x571   :  { %2790 = vmatprep.subr.mxu0 %v2061_v35 }
 0x572   :  { %2782 = vmatmul.mubr.msk.f32.gmra.mxu1 %vm68_vm0, %v1758_v29  ;;  %2791 = vmatpush3.msra.mxu0 %v2061_v35 }
 0x573   :  { %2792 = vmatprep.subr.mxu0 %v2060_v54 }
 0x574   :  { %2793 = vmatpush3.msra.mxu0 %v2060_v54 }
 0x575   :  { %2794 = vmatprep.subr.mxu0 %v2059_v45 }
 0x576   :  { %2795 = vmatpush3.msra.mxu0 %v2059_v45 }
 0x584   :  { %v3962_v56 = vpop.f32.mrf.mxu1 }
 0x586   :  { %v3967_v20 = vpop.f32.mrf.mxu1 }
 0x612   :  { %v2762_v62 = vpop.f32.mrf.mxu1 }
 0x613   :  { %v1890_v18 = vadd.f32 %v2762_v62, %v2388_v12 }
 0x614   :  { %v1884_v17 = vpop.f32.mrf.mxu1 }
 0x615   :  { %v1885_v8 = vadd.f32 %v2388_v12, %v1884_v17  ;;  %1981 = vrot.lane.b32.xlu0 %v1890_v18, %s2915_s9 }
 0x617   :  { %1979 = vrot.lane.b32.xlu1 %v1885_v8, %s2915_s9 }
 0x61a   :  { %v2765_v58 = vpop.f32.mrf.mxu1 }
 0x61b   :  { %v1900_v61 = vadd.f32 %v2765_v58, %v2388_v12 }
 0x61c   :  { %v1894_v13 = vpop.f32.mrf.mxu1 }
 0x61d   :  { %1985 = vrot.lane.b32.xlu1 %v1900_v61, %s2915_s9  ;;  %v1895_v46 = vadd.f32 %v2388_v12, %v1894_v13 }
 0x61e   :  { %v2768_v1 = vpop.f32.mrf.mxu1 }
 0x61f   :  { %v1910_v15 = vadd.f32 %v2768_v1, %v2388_v12 }
 0x620   :  { %v1904_v57 = vpop.f32.mrf.mxu1 }
 0x621   :  { %1983 = vrot.lane.b32.xlu1 %v1895_v46, %s2915_s9  ;;  %1989 = vrot.lane.b32.xlu0 %v1910_v15, %s2915_s9  ;;  %v1905_v3 = vadd.f32 %v2388_v12, %v1904_v57 }
 0x622   :  { %v2771_v36 = vpop.f32.mrf.mxu1 }
 0x623   :  { %v1920_v21 = vadd.f32 %v2771_v36, %v2388_v12 }
 0x624   :  { %v1914_v41 = vpop.f32.mrf.mxu1 }
 0x625   :  { %1987 = vrot.lane.b32.xlu1 %v1905_v3, %s2915_s9  ;;  %1993 = vrot.lane.b32.xlu0 %v1920_v21, %s2915_s9  ;;  %v1915_v32 = vadd.f32 %v2388_v12, %v1914_v41 }
 0x626   :  { %v2774_v24 = vpop.f32.mrf.mxu1 }
 0x627   :  { %v3979_v43 = vadd.f32 %v2774_v24, %v2388_v12 }
 0x628   :  { %v1924_v10 = vpop.f32.mrf.mxu1 }
 0x629   :  { %1991 = vrot.lane.b32.xlu1 %v1915_v32, %s2915_s9  ;;  %1997 = vrot.lane.b32.xlu0 %v3979_v43, %s2915_s9  ;;  %v1925_v47 = vadd.f32 %v2388_v12, %v1924_v10 }
 0x62a   :  { %v2777_v49 = vpop.f32.mrf.mxu1 }
 0x62b   :  { %v3984_v38 = vadd.f32 %v2777_v49, %v2388_v12 }
 0x62c   :  { %v1934_v9 = vpop.f32.mrf.mxu1 }
 0x62d   :  { %1995 = vrot.lane.b32.xlu1 %v1925_v47, %s2915_s9  ;;  %2001 = vrot.lane.b32.xlu0 %v3984_v38, %s2915_s9  ;;  %v1935_v14 = vadd.f32 %v2388_v12, %v1934_v9 }
 0x62e   :  { %v2780_v44 = vpop.f32.mrf.mxu1 }
 0x62f   :  { %v3989_v16 = vadd.f32 %v2780_v44, %v2388_v12 }
 0x630   :  { %v1944_v27 = vpop.f32.mrf.mxu1 }
 0x631   :  { %1999 = vrot.lane.b32.xlu1 %v1935_v14, %s2915_s9  ;;  %2005 = vrot.lane.b32.xlu0 %v3989_v16, %s2915_s9  ;;  %v1945_v60 = vadd.f32 %v2388_v12, %v1944_v27 }
 0x632   :  { %v2783_v55 = vpop.f32.mrf.mxu1 }
 0x633   :  { %v3994_v28 = vadd.f32 %v2783_v55, %v2388_v12 }
 0x634   :  { %v1954_v29 = vpop.f32.mrf.mxu1 }
 0x635   :  { %2003 = vrot.lane.b32.xlu1 %v1945_v60, %s2915_s9  ;;  %2009 = vrot.lane.b32.xlu0 %v3994_v28, %s2915_s9  ;;  %v3999_v42 = vadd.f32 %v2388_v12, %v1954_v29 }
 0x639   :  { %2007 = vrot.lane.b32.xlu1 %v3999_v42, %s2915_s9 }
 0x687   :  { %v1982_v5 = vpop.permute.xlu0 %1981 }
 0x688   :  { %v2028_v53 = vmul.f32 %v1982_v5, %v1890_v18 }
 0x689   :  { %v1980_v35 = vpop.permute.xlu1 %1979 }
 0x68a   :  { %v2027_v54 = vmul.f32 %v1980_v35, %v1885_v8  ;;  %v2044_v62 = vadd.f32 %v2028_v53, %v1890_v18 }
 0x68c   :  { %v2043_v45 = vadd.f32 %v2027_v54, %v1885_v8 }
 0x68e   :  { %2796 = vmatprep.mubr.msk.f32.mxu0 %vm2072_vm5, %v2043_v45 }
 0x68f   :  { %v1986_v17 = vpop.permute.xlu1 %1985  ;;  %2797 = vmatmul.mubr.msk.f32.vlgmr.msra.gmra.mxu0 %vm2072_vm5, %v2044_v62 }
 0x690   :  { %v2030_v58 = vmul.f32 %v1986_v17, %v1900_v61 }
 0x692   :  { %v2046_v36 = vadd.f32 %v2030_v58, %v1900_v61 }
 0x693   :  { %v1984_v13 = vpop.permute.xlu1 %1983  ;;  %v1990_v1 = vpop.permute.xlu0 %1989 }
 0x694   :  { %v2029_v12 = vmul.f32 %v1984_v13, %v1895_v46  ;;  %v2032_v41 = vmul.f32 %v1990_v1, %v1910_v15 }
 0x696   :  { %v2045_v57 = vadd.f32 %v2029_v12, %v1895_v46  ;;  %v2048_v8 = vadd.f32 %v2032_v41, %v1910_v15 }
 0x697   :  { %v1988_v24 = vpop.permute.xlu1 %1987  ;;  %v1994_v10 = vpop.permute.xlu0 %1993 }
 0x698   :  { %v2031_v49 = vmul.f32 %v1988_v24, %v1905_v3  ;;  %2799 = vmatprep.mubr.msk.f32.mxu0 %vm2072_vm5, %v2045_v57  ;;  %v2034_v9 = vmul.f32 %v1994_v10, %v1920_v21 }
 0x699   :  { %2800 = vmatmul.mubr.msk.f32.gmra.mxu0 %vm2072_vm5, %v2046_v36 }
 0x69a   :  { %v2047_v18 = vadd.f32 %v2031_v49, %v1905_v3  ;;  %v2050_v61 = vadd.f32 %v2034_v9, %v1920_v21 }
 0x69b   :  { %v1992_v44 = vpop.permute.xlu1 %1991  ;;  %v1998_v27 = vpop.permute.xlu0 %1997 }
 0x69c   :  { %v2033_v55 = vmul.f32 %v1992_v44, %v1915_v32  ;;  %2802 = vmatprep.mubr.msk.f32.mxu0 %vm2072_vm5, %v2047_v18  ;;  %v2036_v29 = vmul.f32 %v1998_v27, %v3979_v43 }
 0x69d   :  { %2803 = vmatmul.mubr.msk.f32.gmra.mxu0 %vm2072_vm5, %v2048_v8 }
 0x69e   :  { %v2049_v46 = vadd.f32 %v2033_v55, %v1915_v32  ;;  %v2052_v3 = vadd.f32 %v2036_v29, %v3979_v43 }
 0x69f   :  { %v1996_v5 = vpop.permute.xlu1 %1995  ;;  %v2002_v53 = vpop.permute.xlu0 %2001 }
 0x6a0   :  { %v2035_v35 = vmul.f32 %v1996_v5, %v1925_v47  ;;  %2805 = vmatprep.mubr.msk.f32.mxu0 %vm2072_vm5, %v2049_v46  ;;  %v2038_v54 = vmul.f32 %v2002_v53, %v3984_v38 }
 0x6a1   :  { %2806 = vmatmul.mubr.msk.f32.gmra.mxu0 %vm2072_vm5, %v2050_v61 }
 0x6a2   :  { %v2051_v15 = vadd.f32 %v2035_v35, %v1925_v47  ;;  %v2054_v32 = vadd.f32 %v2038_v54, %v3984_v38 }
 0x6a3   :  { %v2000_v45 = vpop.permute.xlu1 %1999  ;;  %v2006_v62 = vpop.permute.xlu0 %2005 }
 0x6a4   :  { %v2037_v17 = vmul.f32 %v2000_v45, %v1935_v14  ;;  %2808 = vmatprep.mubr.msk.f32.mxu0 %vm2072_vm5, %v2051_v15  ;;  %v2040_v58 = vmul.f32 %v2006_v62, %v3989_v16 }
 0x6a5   :  { %2809 = vmatmul.mubr.msk.f32.gmra.mxu0 %vm2072_vm5, %v2052_v3 }
 0x6a6   :  { %v2053_v21 = vadd.f32 %v2037_v17, %v1935_v14  ;;  %v2056_v47 = vadd.f32 %v2040_v58, %v3989_v16 }
 0x6a7   :  { %v2004_v13 = vpop.permute.xlu1 %2003  ;;  %v2010_v12 = vpop.permute.xlu0 %2009 }
 0x6a8   :  { %v2039_v1 = vmul.f32 %v2004_v13, %v1945_v60  ;;  %2811 = vmatprep.mubr.msk.f32.mxu0 %vm2072_vm5, %v2053_v21  ;;  %v2042_v57 = vmul.f32 %v2010_v12, %v3994_v28 }
 0x6a9   :  { %2812 = vmatmul.mubr.msk.f32.gmra.mxu0 %vm2072_vm5, %v2054_v32 }
 0x6aa   :  { %v2055_v43 = vadd.f32 %v2039_v1, %v1945_v60  ;;  %v2058_v14 = vadd.f32 %v2042_v57, %v3994_v28  ;;  %v2742_v60 = vpop.f32.mrf.mxu0 }
 0x6ab   :  { %v2008_v36 = vpop.permute.xlu1 %2007 }
 0x6ac   :  { %v2041_v41 = vmul.f32 %v2008_v36, %v3999_v42  ;;  %2814 = vmatprep.mubr.msk.f32.mxu0 %vm2072_vm5, %v2055_v43  ;;  %v1480_v24 = vpop.f32.mrf.mxu0 }
 0x6ad   :  { %2815 = vmatmul.mubr.msk.f32.gmra.mxu0 %vm2072_vm5, %v2056_v47 }
 0x6ae   :  { %v2057_v38 = vadd.f32 %v2041_v41, %v3999_v42  ;;  %v4029_v16 = vpop.f32.mrf.mxu0  ;;  %v4040_v42 = vld [vmem:[%s4166_s14] ss:$0 sm:$0xff] }
 0x6b0   :  { %2817 = vmatprep.mubr.msk.f32.mxu0 %vm2072_vm5, %v2057_v38  ;;  %v4031_v10 = vpop.f32.mrf.mxu0 }
 0x6b1   :  { %2818 = vmatmul.mubr.msk.f32.gmra.mxu0 %vm2072_vm5, %v2058_v14 }
 0x6b2   :  { %v4033_v49 = vpop.f32.mrf.mxu0 }
 0x6b4   :  { %v4035_v18 = vpop.f32.mrf.mxu0 }
 0x74f   :  { %v2798_v28 = vpop.f32.mrf.mxu0 }
 0x750   :  { %v2193_v8 = vadd.f32 %v2798_v28, %v4040_v42 }
 0x751   :  { %v2187_v9 = vpop.f32.mrf.mxu0 }
 0x752   :  { %v2267_v44 = vadd.f32 %v2193_v8, %v3613_v40  ;;  %v2188_v27 = vadd.f32 %v4040_v42, %v2187_v9 }
 0x754   :  { %v2283_v55 = vadd.f32 %v3765_v51, %v2267_v44  ;;  %v2266_v46 = vadd.f32 %v2188_v27, %v3619_v0 }
 0x756   :  { %2299 = vst.msk [vmem:[%s4167_s15 + $0x8] sm:$0xff] %vm68_vm0, %v2283_v55  ;;  %v2282_v61 = vadd.f32 %v2266_v46, %v3779_v23 }
 0x758   :  { %2298 = vst.msk [vmem:[%s4167_s15] sm:$0xff] %vm68_vm0, %v2282_v61 }
 0x759   :  { %v2801_v29 = vpop.f32.mrf.mxu0 }
 0x75a   :  { %v2203_v40 = vadd.f32 %v2801_v29, %v4040_v42 }
 0x75b   :  { %v2197_v5 = vpop.f32.mrf.mxu0 }
 0x75c   :  { %v2269_v51 = vadd.f32 %v2203_v40, %v3636_v48  ;;  %v2198_v0 = vadd.f32 %v4040_v42, %v2197_v5 }
 0x75d   :  { %v2804_v53 = vpop.f32.mrf.mxu0 }
 0x75e   :  { %v2285_v35 = vadd.f32 %v3793_v59, %v2269_v51  ;;  %v2268_v15 = vadd.f32 %v2198_v0, %v3630_v33  ;;  %v2213_v23 = vadd.f32 %v2804_v53, %v4040_v42 }
 0x75f   :  { %v2207_v3 = vpop.f32.mrf.mxu0 }
 0x760   :  { %2301 = vst.msk [vmem:[%s4167_s15 + $0x18] sm:$0xff] %vm68_vm0, %v2285_v35  ;;  %v2284_v54 = vadd.f32 %v2268_v15, %v3803_v25  ;;  %v2271_v45 = vadd.f32 %v2213_v23, %v3649_v50  ;;  %v2208_v48 = vadd.f32 %v4040_v42, %v2207_v3 }
 0x761   :  { %v2807_v62 = vpop.f32.mrf.mxu0 }
 0x762   :  { %2300 = vst.msk [vmem:[%s4167_s15 + $0x10] sm:$0xff] %vm68_vm0, %v2284_v54  ;;  %v2287_v33 = vadd.f32 %v3809_v34, %v2271_v45  ;;  %v2270_v59 = vadd.f32 %v2208_v48, %v3644_v52  ;;  %v2223_v17 = vadd.f32 %v2807_v62, %v4040_v42 }
 0x763   :  { %v2217_v21 = vpop.f32.mrf.mxu0 }
 0x764   :  { %2303 = vst.msk [vmem:[%s4167_s15 + $0x28] sm:$0xff] %vm68_vm0, %v2287_v33  ;;  %v2286_v50 = vadd.f32 %v2270_v59, %v3819_v19  ;;  %v2273_v25 = vadd.f32 %v2223_v17, %v3667_v30  ;;  %v2218_v32 = vadd.f32 %v4040_v42, %v2217_v21 }
 0x765   :  { %v2810_v58 = vpop.f32.mrf.mxu0 }
 0x766   :  { %2302 = vst.msk [vmem:[%s4167_s15 + $0x20] sm:$0xff] %vm68_vm0, %v2286_v50  ;;  %v2289_v52 = vadd.f32 %v3825_v6, %v2273_v25  ;;  %v2272_v34 = vadd.f32 %v2218_v32, %v3660_v2  ;;  %v2233_v13 = vadd.f32 %v2810_v58, %v4040_v42 }
 0x767   :  { %v2227_v1 = vpop.f32.mrf.mxu0 }
 0x768   :  { %2305 = vst.msk [vmem:[%s4167_s15 + $0x38] sm:$0xff] %vm68_vm0, %v2289_v52  ;;  %v2288_v30 = vadd.f32 %v2272_v34, %v3835_v7  ;;  %v2275_v19 = vadd.f32 %v2233_v13, %v3682_v4  ;;  %v2228_v12 = vadd.f32 %v4040_v42, %v2227_v1 }
 0x769   :  { %v2813_v43 = vpop.f32.mrf.mxu0 }
 0x76a   :  { %2304 = vst.msk [vmem:[%s4167_s15 + $0x30] sm:$0xff] %vm68_vm0, %v2288_v30  ;;  %v2291_v2 = vadd.f32 %v2742_v60, %v2275_v19  ;;  %v2274_v6 = vadd.f32 %v2228_v12, %v3676_v63  ;;  %v2243_v47 = vadd.f32 %v2813_v43, %v4040_v42 }
 0x76b   :  { %v2237_v57 = vpop.f32.mrf.mxu0 }
 0x76c   :  { %2307 = vst.msk [vmem:[%s4167_s15 + $0x48] sm:$0xff] %vm68_vm0, %v2291_v2  ;;  %v2290_v4 = vadd.f32 %v2274_v6, %v1480_v24  ;;  %v2277_v7 = vadd.f32 %v2243_v47, %v3697_v37  ;;  %v2238_v36 = vadd.f32 %v4040_v42, %v2237_v57 }
 0x76d   :  { %v2816_v41 = vpop.f32.mrf.mxu0 }
 0x76e   :  { %2306 = vst.msk [vmem:[%s4167_s15 + $0x40] sm:$0xff] %vm68_vm0, %v2290_v4  ;;  %v2293_v63 = vadd.f32 %v4029_v16, %v2277_v7  ;;  %v2276_v38 = vadd.f32 %v2238_v36, %v3692_v39  ;;  %v2253_v14 = vadd.f32 %v2816_v41, %v4040_v42 }
 0x76f   :  { %v2247_v60 = vpop.f32.mrf.mxu0 }
 0x770   :  { %2309 = vst.msk [vmem:[%s4167_s15 + $0x58] sm:$0xff] %vm68_vm0, %v2293_v63  ;;  %v2292_v37 = vadd.f32 %v2276_v38, %v4031_v10  ;;  %v2279_v24 = vadd.f32 %v2253_v14, %v3715_v26  ;;  %v2248_v28 = vadd.f32 %v4040_v42, %v2247_v60 }
 0x771   :  { %v2819_v8 = vpop.f32.mrf.mxu0 }
 0x772   :  { %2308 = vst.msk [vmem:[%s4167_s15 + $0x50] sm:$0xff] %vm68_vm0, %v2292_v37  ;;  %v2295_v39 = vadd.f32 %v4033_v49, %v2279_v24  ;;  %v2278_v16 = vadd.f32 %v2248_v28, %v3708_v22  ;;  %v2263_v9 = vadd.f32 %v2819_v8, %v4040_v42 }
 0x773   :  { %v2257_v44 = vpop.f32.mrf.mxu0 }
 0x774   :  { %2311 = vst.msk [vmem:[%s4167_s15 + $0x68] sm:$0xff] %vm68_vm0, %v2295_v39  ;;  %v2294_v26 = vadd.f32 %v2278_v16, %v4035_v18  ;;  %v2281_v10 = vadd.f32 %v2263_v9, %v3729_v31  ;;  %v2258_v27 = vadd.f32 %v4040_v42, %v2257_v44 }
 0x776   :  { %2310 = vst.msk [vmem:[%s4167_s15 + $0x60] sm:$0xff] %vm68_vm0, %v2294_v26  ;;  %v2297_v22 = vadd.f32 %v3962_v56, %v2281_v10  ;;  %v2280_v49 = vadd.f32 %v2258_v27, %v3724_v11 }
 0x778   :  { %2313 = vst.msk [vmem:[%s4167_s15 + $0x78] sm:$0xff] %vm68_vm0, %v2297_v22  ;;  %v2296_v18 = vadd.f32 %v2280_v49, %v3967_v20 }
 0x77a   :  { %2312 = vst.msk [vmem:[%s4167_s15 + $0x70] sm:$0xff] %vm68_vm0, %v2296_v18 }

</bundles_post_ra>
